<compile_context>
chip_gen: v7x
topology: tpu7x:2x2x1
jax: 0.10.0
libtpu: 0.0.40
codegen_flags: <defaults>
</compile_context>

<pallas_src>
import jax
import jax.numpy as jnp
from jax.experimental import pallas as pl
from jax.experimental.pallas import tpu as pltpu

dropout = 0.2
n_embd = 60
block_size = 20
n_head = 3
head_size = n_embd // n_head          # 20


def _block_kernel(x_ref, wq_ref, wk_ref, wv_ref, wproj_ref, bproj_ref,
                  w1_ref, b1_ref, w2_ref, b2_ref,
                  g1_ref, be1_ref, g2_ref, be2_ref, o_ref):
    B, T, C = x_ref.shape
    hs = C // n_head
    BT = B * T

    # Fold batch into the row (sublane) dim for all dense matmuls.
    x = x_ref[...].astype(jnp.float32).reshape(BT, C)

    def layer_norm(v, g, b):
        mu = jnp.mean(v, axis=-1, keepdims=True)
        d = v - mu
        var = jnp.mean(d * d, axis=-1, keepdims=True)
        return d * jax.lax.rsqrt(var + jnp.float32(1e-5)) * g + b

    # ---------------- x = x + MultiHeadAttention(ln1(x)) ----------------
    y1 = layer_norm(x, g1_ref[...], be1_ref[...])          # (BT, C)

    # causal mask built once from iotas
    row = jax.lax.broadcasted_iota(jnp.int32, (T, T), 0)
    col = jax.lax.broadcasted_iota(jnp.int32, (T, T), 1)
    causal = (row >= col)[None]                             # (1, T, T)
    neg_inf = jnp.float32(-jnp.inf)

    sa = None
    for h in range(n_head):                                 # unrolled, n_head = 3
        # Leading-dim ref index is a free view -> no lane slicing anywhere.
        qh = jnp.dot(y1, wq_ref[h], preferred_element_type=jnp.float32)   # (BT, hs), scale folded
        kh = jnp.dot(y1, wk_ref[h], preferred_element_type=jnp.float32)
        vh = jnp.dot(y1, wv_ref[h], preferred_element_type=jnp.float32)

        q3 = qh.reshape(B, T, hs)
        k3 = kh.reshape(B, T, hs)
        v3 = vh.reshape(B, T, hs)

        # (q * C**-0.5) @ k^T, batched over B, contracting the last dims (no transpose)
        s = jax.lax.dot_general(q3, k3, (((2,), (2,)), ((0,), (0,))),
                                preferred_element_type=jnp.float32)        # (B, T, T)
        s = jnp.where(causal, s, neg_inf)
        m = jnp.max(s, axis=-1, keepdims=True)
        e = jnp.exp(s - m)
        denom = jnp.sum(e, axis=-1, keepdims=True)
        p = e * pl.reciprocal(denom, approx=True)
        # attention dropout: identity (eval mode)

        o3 = jax.lax.dot_general(p, v3, (((2,), (1,)), ((0,), (0,))),
                                 preferred_element_type=jnp.float32)       # (B, T, hs)

        # Per-head accumulation into the projection (replaces lane-dim concat + one matmul).
        contrib = jnp.dot(o3.reshape(BT, hs), wproj_ref[h],
                          preferred_element_type=jnp.float32)              # (BT, C)
        sa = contrib if sa is None else sa + contrib

    sa = sa + bproj_ref[...]
    # proj dropout: identity (eval mode)
    x2 = x + sa

    # ---------------- x = x + FeedForward(ln2(x)) ----------------
    y2 = layer_norm(x2, g2_ref[...], be2_ref[...])
    hdn = jnp.dot(y2, w1_ref[...], preferred_element_type=jnp.float32) + b1_ref[...]
    hdn = jnp.maximum(hdn, jnp.float32(0.0))
    ff = jnp.dot(hdn, w2_ref[...], preferred_element_type=jnp.float32) + b2_ref[...]
    # ffwd dropout: identity (eval mode)

    o_ref[...] = (x2 + ff).reshape(B, T, C).astype(o_ref.dtype)


def block_forward(x, wq, wk, wv, wproj, bproj, w1, b1, w2, b2, g1, be1, g2, be2):
    """x: (B, T, C) f32.

    wq/wk/wv: (n_head, C, hs) per-head projection weights, (in, out) layout,
              with the attention scale C**-0.5 already folded into wq.
    wproj:    (n_head, hs, C) per-head row-split of the output projection.
    biases / LN params as (1, dim).
    """
    B, T, C = x.shape
    hs = C // n_head
    assert T <= block_size and C == n_embd

    whole = lambda i: (0, 0, 0)
    mat = lambda i: (0, 0)

    return pl.pallas_call(
        _block_kernel,
        out_shape=jax.ShapeDtypeStruct((B, T, C), x.dtype),
        grid=(1,),                                   # whole batch in a single step
        in_specs=[
            pl.BlockSpec((B, T, C), whole),          # x (full batch in one block)
            pl.BlockSpec((n_head, C, hs), whole),    # Wq (scale folded)
            pl.BlockSpec((n_head, C, hs), whole),    # Wk
            pl.BlockSpec((n_head, C, hs), whole),    # Wv
            pl.BlockSpec((n_head, hs, C), whole),    # Wproj, split per head
            pl.BlockSpec((1, C), mat),               # proj bias
            pl.BlockSpec((C, 4 * C), mat),           # ffwd W1
            pl.BlockSpec((1, 4 * C), mat),           # ffwd b1
            pl.BlockSpec((4 * C, C), mat),           # ffwd W2
            pl.BlockSpec((1, C), mat),               # ffwd b2
            pl.BlockSpec((1, C), mat),               # ln1 gamma
            pl.BlockSpec((1, C), mat),               # ln1 beta
            pl.BlockSpec((1, C), mat),               # ln2 gamma
            pl.BlockSpec((1, C), mat),               # ln2 beta
        ],
        out_specs=pl.BlockSpec((B, T, C), whole),
        compiler_params=pltpu.CompilerParams(
            # Single tiny step: do NOT split across v7x's two TensorCores.
            dimension_semantics=("arbitrary",),
        ),
    )(x, wq, wk, wv, wproj, bproj, w1, b1, w2, b2, g1, be1, g2, be2)


def block_forward_ref(x, wq, wk, wv, wproj, bproj, w1, b1, w2, b2, g1, be1, g2, be2):
    """Pure-JAX reference mirroring the PyTorch Block (eval mode).

    Takes the same packed weights as the kernel (attention scale already folded into wq),
    which is mathematically identical to the PyTorch formulation.
    """
    B, T, C = x.shape

    def layer_norm(v, g, b):
        mu = v.mean(-1, keepdims=True)
        var = ((v - mu) ** 2).mean(-1, keepdims=True)
        return (v - mu) * jax.lax.rsqrt(var + 1e-5) * g + b

    y1 = layer_norm(x, g1, be1)
    mask = jnp.tril(jnp.ones((T, T), dtype=bool))
    sa = jnp.zeros_like(x)
    for h in range(n_head):
        qh = y1 @ wq[h]
        kh = y1 @ wk[h]
        vh = y1 @ wv[h]
        wei = qh @ jnp.swapaxes(kh, -1, -2)           # scale already folded into wq
        wei = jnp.where(mask[None], wei, -jnp.inf)
        wei = jax.nn.softmax(wei, axis=-1)
        sa = sa + (wei @ vh) @ wproj[h]
    sa = sa + bproj[0]
    x2 = x + sa
    y2 = layer_norm(x2, g2, be2)
    ff = jax.nn.relu(y2 @ w1 + b1[0]) @ w2 + b2[0]
    return x2 + ff


if __name__ == "__main__":
    key = jax.random.PRNGKey(0)
    keys = jax.random.split(key, 16)

    B, T, C = 2, 8, n_embd
    hs = head_size

    x = jax.random.normal(keys[0], (B, T, C), dtype=jnp.float32)

    def u(k, shape, bound):
        return jax.random.uniform(k, shape, jnp.float32, minval=-bound, maxval=bound)

    bnd = 1.0 / (C ** 0.5)
    # per-head nn.Linear(n_embd, head_size, bias=False) weights, torch layout (hs, C)
    Wk = [u(keys[1 + h], (hs, C), bnd) for h in range(n_head)]
    Wq = [u(keys[4 + h], (hs, C), bnd) for h in range(n_head)]
    Wv = [u(keys[7 + h], (hs, C), bnd) for h in range(n_head)]

    scale = jnp.float32(C) ** jnp.float32(-0.5)        # NOTE: C (=n_embd), as in the source
    wq = jnp.stack([w.T for w in Wq]) * scale          # (n_head, C, hs), scale folded in
    wk = jnp.stack([w.T for w in Wk])                  # (n_head, C, hs)
    wv = jnp.stack([w.T for w in Wv])                  # (n_head, C, hs)

    Wp = u(keys[10], (C, C), bnd)                      # nn.Linear(C, C)
    bp = u(keys[11], (C,), bnd)
    # split the (in, out) projection weight per head along the input (row) dim
    wproj = jnp.stack([Wp.T[h * hs:(h + 1) * hs, :] for h in range(n_head)])  # (n_head, hs, C)

    W1 = u(keys[12], (4 * C, C), 1.0 / (C ** 0.5))          # nn.Linear(C, 4C)
    b1 = u(keys[13], (4 * C,), 1.0 / (C ** 0.5))
    W2 = u(keys[14], (C, 4 * C), 1.0 / ((4 * C) ** 0.5))    # nn.Linear(4C, C)
    b2 = u(keys[15], (C,), 1.0 / ((4 * C) ** 0.5))

    # LayerNorm params (perturbed from 1/0 so the check is meaningful)
    g1 = 1.0 + 0.1 * jax.random.normal(jax.random.PRNGKey(1), (C,), jnp.float32)
    be1 = 0.1 * jax.random.normal(jax.random.PRNGKey(2), (C,), jnp.float32)
    g2 = 1.0 + 0.1 * jax.random.normal(jax.random.PRNGKey(3), (C,), jnp.float32)
    be2 = 0.1 * jax.random.normal(jax.random.PRNGKey(4), (C,), jnp.float32)

    args = (x, wq, wk, wv, wproj, bp.reshape(1, C),
            W1.T, b1.reshape(1, 4 * C), W2.T, b2.reshape(1, C),
            g1.reshape(1, C), be1.reshape(1, C), g2.reshape(1, C), be2.reshape(1, C))

    out = jax.block_until_ready(block_forward(*args))
    ref = block_forward_ref(*args)

    assert out.shape == (B, T, C)
    # tolerance accounts for approx-reciprocal softmax normalization (EUP vrcp)
    assert jnp.allclose(out, ref, atol=3e-3, rtol=3e-3), (
        f"mismatch vs reference: max abs err {jnp.max(jnp.abs(out - ref))}")

    print("KERNEL_OK")
</pallas_src>

<mosaic_0001>
module attributes {stable_mosaic.version = 11 : i64} {
  func.func @_block_kernel(%arg0: i32, %arg1: memref<2x8x60xf32, #tpu.memory_space<vmem>>, %arg2: memref<3x60x20xf32, #tpu.memory_space<vmem>>, %arg3: memref<3x60x20xf32, #tpu.memory_space<vmem>>, %arg4: memref<3x60x20xf32, #tpu.memory_space<vmem>>, %arg5: memref<3x20x60xf32, #tpu.memory_space<vmem>>, %arg6: memref<1x60xf32, #tpu.memory_space<vmem>>, %arg7: memref<60x240xf32, #tpu.memory_space<vmem>>, %arg8: memref<1x240xf32, #tpu.memory_space<vmem>>, %arg9: memref<240x60xf32, #tpu.memory_space<vmem>>, %arg10: memref<1x60xf32, #tpu.memory_space<vmem>>, %arg11: memref<1x60xf32, #tpu.memory_space<vmem>>, %arg12: memref<1x60xf32, #tpu.memory_space<vmem>>, %arg13: memref<1x60xf32, #tpu.memory_space<vmem>>, %arg14: memref<1x60xf32, #tpu.memory_space<vmem>>, %arg15: memref<2x8x60xf32, #tpu.memory_space<vmem>>) attributes {dimension_semantics = [#tpu.dimension_semantics<arbitrary>], iteration_bounds = array<i64: 1>, scalar_prefetch = 0 : i64, scratch_operands = 0 : i64, tpu.core_type = #tpu.core_type<tc>, window_params = [{pipeline_mode = #tpu.pipeline_mode<synchronous>, transform_indices = @transform_0, window_bounds = array<i64: 2, 8, 60>}, {pipeline_mode = #tpu.pipeline_mode<synchronous>, transform_indices = @transform_1, window_bounds = array<i64: 3, 60, 20>}, {pipeline_mode = #tpu.pipeline_mode<synchronous>, transform_indices = @transform_2, window_bounds = array<i64: 3, 60, 20>}, {pipeline_mode = #tpu.pipeline_mode<synchronous>, transform_indices = @transform_3, window_bounds = array<i64: 3, 60, 20>}, {pipeline_mode = #tpu.pipeline_mode<synchronous>, transform_indices = @transform_4, window_bounds = array<i64: 3, 20, 60>}, {pipeline_mode = #tpu.pipeline_mode<synchronous>, transform_indices = @transform_5, window_bounds = array<i64: 1, 60>}, {pipeline_mode = #tpu.pipeline_mode<synchronous>, transform_indices = @transform_6, window_bounds = array<i64: 60, 240>}, {pipeline_mode = #tpu.pipeline_mode<synchronous>, transform_indices = @transform_7, window_bounds = array<i64: 1, 240>}, {pipeline_mode = #tpu.pipeline_mode<synchronous>, transform_indices = @transform_8, window_bounds = array<i64: 240, 60>}, {pipeline_mode = #tpu.pipeline_mode<synchronous>, transform_indices = @transform_9, window_bounds = array<i64: 1, 60>}, {pipeline_mode = #tpu.pipeline_mode<synchronous>, transform_indices = @transform_10, window_bounds = array<i64: 1, 60>}, {pipeline_mode = #tpu.pipeline_mode<synchronous>, transform_indices = @transform_11, window_bounds = array<i64: 1, 60>}, {pipeline_mode = #tpu.pipeline_mode<synchronous>, transform_indices = @transform_12, window_bounds = array<i64: 1, 60>}, {pipeline_mode = #tpu.pipeline_mode<synchronous>, transform_indices = @transform_13, window_bounds = array<i64: 1, 60>}, {pipeline_mode = #tpu.pipeline_mode<synchronous>, transform_indices = @transform_14, window_bounds = array<i64: 2, 8, 60>}]} {
    %c0 = arith.constant 0 : index
    %c0_0 = arith.constant 0 : index
    %c0_1 = arith.constant 0 : index
    %0 = vector.load %arg1[%c0, %c0_0, %c0_1] : memref<2x8x60xf32, #tpu.memory_space<vmem>>, vector<2x8x60xf32>
    %1 = vector.shape_cast %0 : vector<2x8x60xf32> to vector<16x60xf32>
    %c0_2 = arith.constant 0 : index
    %c0_3 = arith.constant 0 : index
    %2 = vector.load %arg11[%c0_2, %c0_3] : memref<1x60xf32, #tpu.memory_space<vmem>>, vector<1x60xf32>
    %c0_4 = arith.constant 0 : index
    %c0_5 = arith.constant 0 : index
    %3 = vector.load %arg12[%c0_4, %c0_5] : memref<1x60xf32, #tpu.memory_space<vmem>>, vector<1x60xf32>
    %cst = arith.constant dense<0.000000e+00> : vector<16xf32>
    %4 = vector.multi_reduction <add>, %1, %cst [1] : vector<16x60xf32> to vector<16xf32>
    %5 = vector.shape_cast %4 : vector<16xf32> to vector<16x1xf32>
    %cst_6 = arith.constant 6.000000e+01 : f32
    %6 = vector.broadcast %cst_6 : f32 to vector<16x1xf32>
    %7 = arith.divf %5, %6 : vector<16x1xf32>
    %8 = vector.broadcast %7 : vector<16x1xf32> to vector<16x60xf32>
    %9 = arith.subf %1, %8 : vector<16x60xf32>
    %10 = arith.mulf %9, %9 : vector<16x60xf32>
    %cst_7 = arith.constant dense<0.000000e+00> : vector<16xf32>
    %11 = vector.multi_reduction <add>, %10, %cst_7 [1] : vector<16x60xf32> to vector<16xf32>
    %12 = vector.shape_cast %11 : vector<16xf32> to vector<16x1xf32>
    %cst_8 = arith.constant 6.000000e+01 : f32
    %13 = vector.broadcast %cst_8 : f32 to vector<16x1xf32>
    %14 = arith.divf %12, %13 : vector<16x1xf32>
    %cst_9 = arith.constant 9.99999974E-6 : f32
    %15 = vector.broadcast %cst_9 : f32 to vector<16x1xf32>
    %16 = arith.addf %14, %15 : vector<16x1xf32>
    %17 = math.rsqrt %16 : vector<16x1xf32>
    %18 = vector.broadcast %17 : vector<16x1xf32> to vector<16x60xf32>
    %19 = arith.mulf %9, %18 : vector<16x60xf32>
    %20 = vector.broadcast %2 : vector<1x60xf32> to vector<16x60xf32>
    %21 = arith.mulf %19, %20 : vector<16x60xf32>
    %22 = vector.broadcast %3 : vector<1x60xf32> to vector<16x60xf32>
    %23 = arith.addf %21, %22 : vector<16x60xf32>
    %24 = tpu.iota {dimensions = array<i32: 0>} : vector<8x8xi32>
    %25 = tpu.iota {dimensions = array<i32: 1>} : vector<8x8xi32>
    %26 = arith.cmpi sge, %24, %25 : vector<8x8xi32>
    %27 = vector.shape_cast %26 : vector<8x8xi1> to vector<1x8x8xi1>
    %c0_10 = arith.constant 0 : index
    %c0_11 = arith.constant 0 : index
    %c0_12 = arith.constant 0 : index
    %28 = vector.load %arg2[%c0_10, %c0_11, %c0_12] : memref<3x60x20xf32, #tpu.memory_space<vmem>>, vector<1x60x20xf32>
    %29 = vector.shape_cast %28 : vector<1x60x20xf32> to vector<60x20xf32>
    %cst_13 = arith.constant dense<0.000000e+00> : vector<16x20xf32>
    %30 = tpu.matmul %23, %29, %cst_13 {dimension_numbers = #tpu.dot_dimension_numbers<[1], [0], [0], [1], [0, 0, 1, 1], [], []>} : vector<16x60xf32>, vector<60x20xf32>, vector<16x20xf32> -> vector<16x20xf32>
    %c0_14 = arith.constant 0 : index
    %c0_15 = arith.constant 0 : index
    %c0_16 = arith.constant 0 : index
    %31 = vector.load %arg3[%c0_14, %c0_15, %c0_16] : memref<3x60x20xf32, #tpu.memory_space<vmem>>, vector<1x60x20xf32>
    %32 = vector.shape_cast %31 : vector<1x60x20xf32> to vector<60x20xf32>
    %cst_17 = arith.constant dense<0.000000e+00> : vector<16x20xf32>
    %33 = tpu.matmul %23, %32, %cst_17 {dimension_numbers = #tpu.dot_dimension_numbers<[1], [0], [0], [1], [0, 0, 1, 1], [], []>} : vector<16x60xf32>, vector<60x20xf32>, vector<16x20xf32> -> vector<16x20xf32>
    %c0_18 = arith.constant 0 : index
    %c0_19 = arith.constant 0 : index
    %c0_20 = arith.constant 0 : index
    %34 = vector.load %arg4[%c0_18, %c0_19, %c0_20] : memref<3x60x20xf32, #tpu.memory_space<vmem>>, vector<1x60x20xf32>
    %35 = vector.shape_cast %34 : vector<1x60x20xf32> to vector<60x20xf32>
    %cst_21 = arith.constant dense<0.000000e+00> : vector<16x20xf32>
    %36 = tpu.matmul %23, %35, %cst_21 {dimension_numbers = #tpu.dot_dimension_numbers<[1], [0], [0], [1], [0, 0, 1, 1], [], []>} : vector<16x60xf32>, vector<60x20xf32>, vector<16x20xf32> -> vector<16x20xf32>
    %37 = vector.shape_cast %30 : vector<16x20xf32> to vector<2x8x20xf32>
    %38 = vector.shape_cast %33 : vector<16x20xf32> to vector<2x8x20xf32>
    %39 = vector.shape_cast %36 : vector<16x20xf32> to vector<2x8x20xf32>
    %cst_22 = arith.constant dense<0.000000e+00> : vector<2x8x8xf32>
    %40 = tpu.matmul %37, %38, %cst_22 {dimension_numbers = #tpu.dot_dimension_numbers<[2], [2], [1], [1], [0, 0, 0, 1, 1, 1], [0], [0]>} : vector<2x8x20xf32>, vector<2x8x20xf32>, vector<2x8x8xf32> -> vector<2x8x8xf32>
    %cst_23 = arith.constant 0xFF800000 : f32
    %41 = vector.shape_cast %27 : vector<1x8x8xi1> to vector<1x8x8xi1>
    %42 = vector.broadcast %41 : vector<1x8x8xi1> to vector<2x8x8xi1>
    %43 = vector.broadcast %cst_23 : f32 to vector<2x8x8xf32>
    %44 = arith.select %42, %40, %43 : vector<2x8x8xi1>, vector<2x8x8xf32>
    %cst_24 = arith.constant dense<0xFF800000> : vector<2x8xf32>
    %45 = vector.multi_reduction <maximumf>, %44, %cst_24 [2] : vector<2x8x8xf32> to vector<2x8xf32>
    %46 = vector.shape_cast %45 : vector<2x8xf32> to vector<2x8x1xf32>
    %47 = vector.broadcast %46 : vector<2x8x1xf32> to vector<2x8x8xf32>
    %48 = arith.subf %44, %47 : vector<2x8x8xf32>
    %49 = math.exp %48 : vector<2x8x8xf32>
    %cst_25 = arith.constant dense<0.000000e+00> : vector<2x8xf32>
    %50 = vector.multi_reduction <add>, %49, %cst_25 [2] : vector<2x8x8xf32> to vector<2x8xf32>
    %51 = vector.shape_cast %50 : vector<2x8xf32> to vector<2x8x1xf32>
    %52 = tpu.reciprocal %51 {approx = true} : vector<2x8x1xf32> -> vector<2x8x1xf32>
    %53 = vector.broadcast %52 : vector<2x8x1xf32> to vector<2x8x8xf32>
    %54 = arith.mulf %49, %53 : vector<2x8x8xf32>
    %cst_26 = arith.constant dense<0.000000e+00> : vector<2x8x20xf32>
    %55 = tpu.matmul %54, %39, %cst_26 {dimension_numbers = #tpu.dot_dimension_numbers<[2], [1], [1], [2], [0, 0, 0, 1, 1, 2], [0], [0]>} : vector<2x8x8xf32>, vector<2x8x20xf32>, vector<2x8x20xf32> -> vector<2x8x20xf32>
    %56 = vector.shape_cast %55 : vector<2x8x20xf32> to vector<16x20xf32>
    %c0_27 = arith.constant 0 : index
    %c0_28 = arith.constant 0 : index
    %c0_29 = arith.constant 0 : index
    %57 = vector.load %arg5[%c0_27, %c0_28, %c0_29] : memref<3x20x60xf32, #tpu.memory_space<vmem>>, vector<1x20x60xf32>
    %58 = vector.shape_cast %57 : vector<1x20x60xf32> to vector<20x60xf32>
    %cst_30 = arith.constant dense<0.000000e+00> : vector<16x60xf32>
    %59 = tpu.matmul %56, %58, %cst_30 {dimension_numbers = #tpu.dot_dimension_numbers<[1], [0], [0], [1], [0, 0, 1, 1], [], []>} : vector<16x20xf32>, vector<20x60xf32>, vector<16x60xf32> -> vector<16x60xf32>
    %c1 = arith.constant 1 : index
    %c0_31 = arith.constant 0 : index
    %c0_32 = arith.constant 0 : index
    %60 = vector.load %arg2[%c1, %c0_31, %c0_32] : memref<3x60x20xf32, #tpu.memory_space<vmem>>, vector<1x60x20xf32>
    %61 = vector.shape_cast %60 : vector<1x60x20xf32> to vector<60x20xf32>
    %cst_33 = arith.constant dense<0.000000e+00> : vector<16x20xf32>
    %62 = tpu.matmul %23, %61, %cst_33 {dimension_numbers = #tpu.dot_dimension_numbers<[1], [0], [0], [1], [0, 0, 1, 1], [], []>} : vector<16x60xf32>, vector<60x20xf32>, vector<16x20xf32> -> vector<16x20xf32>
    %c1_34 = arith.constant 1 : index
    %c0_35 = arith.constant 0 : index
    %c0_36 = arith.constant 0 : index
    %63 = vector.load %arg3[%c1_34, %c0_35, %c0_36] : memref<3x60x20xf32, #tpu.memory_space<vmem>>, vector<1x60x20xf32>
    %64 = vector.shape_cast %63 : vector<1x60x20xf32> to vector<60x20xf32>
    %cst_37 = arith.constant dense<0.000000e+00> : vector<16x20xf32>
    %65 = tpu.matmul %23, %64, %cst_37 {dimension_numbers = #tpu.dot_dimension_numbers<[1], [0], [0], [1], [0, 0, 1, 1], [], []>} : vector<16x60xf32>, vector<60x20xf32>, vector<16x20xf32> -> vector<16x20xf32>
    %c1_38 = arith.constant 1 : index
    %c0_39 = arith.constant 0 : index
    %c0_40 = arith.constant 0 : index
    %66 = vector.load %arg4[%c1_38, %c0_39, %c0_40] : memref<3x60x20xf32, #tpu.memory_space<vmem>>, vector<1x60x20xf32>
    %67 = vector.shape_cast %66 : vector<1x60x20xf32> to vector<60x20xf32>
    %cst_41 = arith.constant dense<0.000000e+00> : vector<16x20xf32>
    %68 = tpu.matmul %23, %67, %cst_41 {dimension_numbers = #tpu.dot_dimension_numbers<[1], [0], [0], [1], [0, 0, 1, 1], [], []>} : vector<16x60xf32>, vector<60x20xf32>, vector<16x20xf32> -> vector<16x20xf32>
    %69 = vector.shape_cast %62 : vector<16x20xf32> to vector<2x8x20xf32>
    %70 = vector.shape_cast %65 : vector<16x20xf32> to vector<2x8x20xf32>
    %71 = vector.shape_cast %68 : vector<16x20xf32> to vector<2x8x20xf32>
    %cst_42 = arith.constant dense<0.000000e+00> : vector<2x8x8xf32>
    %72 = tpu.matmul %69, %70, %cst_42 {dimension_numbers = #tpu.dot_dimension_numbers<[2], [2], [1], [1], [0, 0, 0, 1, 1, 1], [0], [0]>} : vector<2x8x20xf32>, vector<2x8x20xf32>, vector<2x8x8xf32> -> vector<2x8x8xf32>
    %cst_43 = arith.constant 0xFF800000 : f32
    %73 = vector.shape_cast %27 : vector<1x8x8xi1> to vector<1x8x8xi1>
    %74 = vector.broadcast %73 : vector<1x8x8xi1> to vector<2x8x8xi1>
    %75 = vector.broadcast %cst_43 : f32 to vector<2x8x8xf32>
    %76 = arith.select %74, %72, %75 : vector<2x8x8xi1>, vector<2x8x8xf32>
    %cst_44 = arith.constant dense<0xFF800000> : vector<2x8xf32>
    %77 = vector.multi_reduction <maximumf>, %76, %cst_44 [2] : vector<2x8x8xf32> to vector<2x8xf32>
    %78 = vector.shape_cast %77 : vector<2x8xf32> to vector<2x8x1xf32>
    %79 = vector.broadcast %78 : vector<2x8x1xf32> to vector<2x8x8xf32>
    %80 = arith.subf %76, %79 : vector<2x8x8xf32>
    %81 = math.exp %80 : vector<2x8x8xf32>
    %cst_45 = arith.constant dense<0.000000e+00> : vector<2x8xf32>
    %82 = vector.multi_reduction <add>, %81, %cst_45 [2] : vector<2x8x8xf32> to vector<2x8xf32>
    %83 = vector.shape_cast %82 : vector<2x8xf32> to vector<2x8x1xf32>
    %84 = tpu.reciprocal %83 {approx = true} : vector<2x8x1xf32> -> vector<2x8x1xf32>
    %85 = vector.broadcast %84 : vector<2x8x1xf32> to vector<2x8x8xf32>
    %86 = arith.mulf %81, %85 : vector<2x8x8xf32>
    %cst_46 = arith.constant dense<0.000000e+00> : vector<2x8x20xf32>
    %87 = tpu.matmul %86, %71, %cst_46 {dimension_numbers = #tpu.dot_dimension_numbers<[2], [1], [1], [2], [0, 0, 0, 1, 1, 2], [0], [0]>} : vector<2x8x8xf32>, vector<2x8x20xf32>, vector<2x8x20xf32> -> vector<2x8x20xf32>
    %88 = vector.shape_cast %87 : vector<2x8x20xf32> to vector<16x20xf32>
    %c1_47 = arith.constant 1 : index
    %c0_48 = arith.constant 0 : index
    %c0_49 = arith.constant 0 : index
    %89 = vector.load %arg5[%c1_47, %c0_48, %c0_49] : memref<3x20x60xf32, #tpu.memory_space<vmem>>, vector<1x20x60xf32>
    %90 = vector.shape_cast %89 : vector<1x20x60xf32> to vector<20x60xf32>
    %cst_50 = arith.constant dense<0.000000e+00> : vector<16x60xf32>
    %91 = tpu.matmul %88, %90, %cst_50 {dimension_numbers = #tpu.dot_dimension_numbers<[1], [0], [0], [1], [0, 0, 1, 1], [], []>} : vector<16x20xf32>, vector<20x60xf32>, vector<16x60xf32> -> vector<16x60xf32>
    %92 = arith.addf %59, %91 : vector<16x60xf32>
    %c2 = arith.constant 2 : index
    %c0_51 = arith.constant 0 : index
    %c0_52 = arith.constant 0 : index
    %93 = vector.load %arg2[%c2, %c0_51, %c0_52] : memref<3x60x20xf32, #tpu.memory_space<vmem>>, vector<1x60x20xf32>
    %94 = vector.shape_cast %93 : vector<1x60x20xf32> to vector<60x20xf32>
    %cst_53 = arith.constant dense<0.000000e+00> : vector<16x20xf32>
    %95 = tpu.matmul %23, %94, %cst_53 {dimension_numbers = #tpu.dot_dimension_numbers<[1], [0], [0], [1], [0, 0, 1, 1], [], []>} : vector<16x60xf32>, vector<60x20xf32>, vector<16x20xf32> -> vector<16x20xf32>
    %c2_54 = arith.constant 2 : index
    %c0_55 = arith.constant 0 : index
    %c0_56 = arith.constant 0 : index
    %96 = vector.load %arg3[%c2_54, %c0_55, %c0_56] : memref<3x60x20xf32, #tpu.memory_space<vmem>>, vector<1x60x20xf32>
    %97 = vector.shape_cast %96 : vector<1x60x20xf32> to vector<60x20xf32>
    %cst_57 = arith.constant dense<0.000000e+00> : vector<16x20xf32>
    %98 = tpu.matmul %23, %97, %cst_57 {dimension_numbers = #tpu.dot_dimension_numbers<[1], [0], [0], [1], [0, 0, 1, 1], [], []>} : vector<16x60xf32>, vector<60x20xf32>, vector<16x20xf32> -> vector<16x20xf32>
    %c2_58 = arith.constant 2 : index
    %c0_59 = arith.constant 0 : index
    %c0_60 = arith.constant 0 : index
    %99 = vector.load %arg4[%c2_58, %c0_59, %c0_60] : memref<3x60x20xf32, #tpu.memory_space<vmem>>, vector<1x60x20xf32>
    %100 = vector.shape_cast %99 : vector<1x60x20xf32> to vector<60x20xf32>
    %cst_61 = arith.constant dense<0.000000e+00> : vector<16x20xf32>
    %101 = tpu.matmul %23, %100, %cst_61 {dimension_numbers = #tpu.dot_dimension_numbers<[1], [0], [0], [1], [0, 0, 1, 1], [], []>} : vector<16x60xf32>, vector<60x20xf32>, vector<16x20xf32> -> vector<16x20xf32>
    %102 = vector.shape_cast %95 : vector<16x20xf32> to vector<2x8x20xf32>
    %103 = vector.shape_cast %98 : vector<16x20xf32> to vector<2x8x20xf32>
    %104 = vector.shape_cast %101 : vector<16x20xf32> to vector<2x8x20xf32>
    %cst_62 = arith.constant dense<0.000000e+00> : vector<2x8x8xf32>
    %105 = tpu.matmul %102, %103, %cst_62 {dimension_numbers = #tpu.dot_dimension_numbers<[2], [2], [1], [1], [0, 0, 0, 1, 1, 1], [0], [0]>} : vector<2x8x20xf32>, vector<2x8x20xf32>, vector<2x8x8xf32> -> vector<2x8x8xf32>
    %cst_63 = arith.constant 0xFF800000 : f32
    %106 = vector.shape_cast %27 : vector<1x8x8xi1> to vector<1x8x8xi1>
    %107 = vector.broadcast %106 : vector<1x8x8xi1> to vector<2x8x8xi1>
    %108 = vector.broadcast %cst_63 : f32 to vector<2x8x8xf32>
    %109 = arith.select %107, %105, %108 : vector<2x8x8xi1>, vector<2x8x8xf32>
    %cst_64 = arith.constant dense<0xFF800000> : vector<2x8xf32>
    %110 = vector.multi_reduction <maximumf>, %109, %cst_64 [2] : vector<2x8x8xf32> to vector<2x8xf32>
    %111 = vector.shape_cast %110 : vector<2x8xf32> to vector<2x8x1xf32>
    %112 = vector.broadcast %111 : vector<2x8x1xf32> to vector<2x8x8xf32>
    %113 = arith.subf %109, %112 : vector<2x8x8xf32>
    %114 = math.exp %113 : vector<2x8x8xf32>
    %cst_65 = arith.constant dense<0.000000e+00> : vector<2x8xf32>
    %115 = vector.multi_reduction <add>, %114, %cst_65 [2] : vector<2x8x8xf32> to vector<2x8xf32>
    %116 = vector.shape_cast %115 : vector<2x8xf32> to vector<2x8x1xf32>
    %117 = tpu.reciprocal %116 {approx = true} : vector<2x8x1xf32> -> vector<2x8x1xf32>
    %118 = vector.broadcast %117 : vector<2x8x1xf32> to vector<2x8x8xf32>
    %119 = arith.mulf %114, %118 : vector<2x8x8xf32>
    %cst_66 = arith.constant dense<0.000000e+00> : vector<2x8x20xf32>
    %120 = tpu.matmul %119, %104, %cst_66 {dimension_numbers = #tpu.dot_dimension_numbers<[2], [1], [1], [2], [0, 0, 0, 1, 1, 2], [0], [0]>} : vector<2x8x8xf32>, vector<2x8x20xf32>, vector<2x8x20xf32> -> vector<2x8x20xf32>
    %121 = vector.shape_cast %120 : vector<2x8x20xf32> to vector<16x20xf32>
    %c2_67 = arith.constant 2 : index
    %c0_68 = arith.constant 0 : index
    %c0_69 = arith.constant 0 : index
    %122 = vector.load %arg5[%c2_67, %c0_68, %c0_69] : memref<3x20x60xf32, #tpu.memory_space<vmem>>, vector<1x20x60xf32>
    %123 = vector.shape_cast %122 : vector<1x20x60xf32> to vector<20x60xf32>
    %cst_70 = arith.constant dense<0.000000e+00> : vector<16x60xf32>
    %124 = tpu.matmul %121, %123, %cst_70 {dimension_numbers = #tpu.dot_dimension_numbers<[1], [0], [0], [1], [0, 0, 1, 1], [], []>} : vector<16x20xf32>, vector<20x60xf32>, vector<16x60xf32> -> vector<16x60xf32>
    %125 = arith.addf %92, %124 : vector<16x60xf32>
    %c0_71 = arith.constant 0 : index
    %c0_72 = arith.constant 0 : index
    %126 = vector.load %arg6[%c0_71, %c0_72] : memref<1x60xf32, #tpu.memory_space<vmem>>, vector<1x60xf32>
    %127 = vector.broadcast %126 : vector<1x60xf32> to vector<16x60xf32>
    %128 = arith.addf %125, %127 : vector<16x60xf32>
    %129 = arith.addf %1, %128 : vector<16x60xf32>
    %c0_73 = arith.constant 0 : index
    %c0_74 = arith.constant 0 : index
    %130 = vector.load %arg13[%c0_73, %c0_74] : memref<1x60xf32, #tpu.memory_space<vmem>>, vector<1x60xf32>
    %c0_75 = arith.constant 0 : index
    %c0_76 = arith.constant 0 : index
    %131 = vector.load %arg14[%c0_75, %c0_76] : memref<1x60xf32, #tpu.memory_space<vmem>>, vector<1x60xf32>
    %cst_77 = arith.constant dense<0.000000e+00> : vector<16xf32>
    %132 = vector.multi_reduction <add>, %129, %cst_77 [1] : vector<16x60xf32> to vector<16xf32>
    %133 = vector.shape_cast %132 : vector<16xf32> to vector<16x1xf32>
    %cst_78 = arith.constant 6.000000e+01 : f32
    %134 = vector.broadcast %cst_78 : f32 to vector<16x1xf32>
    %135 = arith.divf %133, %134 : vector<16x1xf32>
    %136 = vector.broadcast %135 : vector<16x1xf32> to vector<16x60xf32>
    %137 = arith.subf %129, %136 : vector<16x60xf32>
    %138 = arith.mulf %137, %137 : vector<16x60xf32>
    %cst_79 = arith.constant dense<0.000000e+00> : vector<16xf32>
    %139 = vector.multi_reduction <add>, %138, %cst_79 [1] : vector<16x60xf32> to vector<16xf32>
    %140 = vector.shape_cast %139 : vector<16xf32> to vector<16x1xf32>
    %cst_80 = arith.constant 6.000000e+01 : f32
    %141 = vector.broadcast %cst_80 : f32 to vector<16x1xf32>
    %142 = arith.divf %140, %141 : vector<16x1xf32>
    %cst_81 = arith.constant 9.99999974E-6 : f32
    %143 = vector.broadcast %cst_81 : f32 to vector<16x1xf32>
    %144 = arith.addf %142, %143 : vector<16x1xf32>
    %145 = math.rsqrt %144 : vector<16x1xf32>
    %146 = vector.broadcast %145 : vector<16x1xf32> to vector<16x60xf32>
    %147 = arith.mulf %137, %146 : vector<16x60xf32>
    %148 = vector.broadcast %130 : vector<1x60xf32> to vector<16x60xf32>
    %149 = arith.mulf %147, %148 : vector<16x60xf32>
    %150 = vector.broadcast %131 : vector<1x60xf32> to vector<16x60xf32>
    %151 = arith.addf %149, %150 : vector<16x60xf32>
    %c0_82 = arith.constant 0 : index
    %c0_83 = arith.constant 0 : index
    %152 = vector.load %arg7[%c0_82, %c0_83] : memref<60x240xf32, #tpu.memory_space<vmem>>, vector<60x240xf32>
    %cst_84 = arith.constant dense<0.000000e+00> : vector<16x240xf32>
    %153 = tpu.matmul %151, %152, %cst_84 {dimension_numbers = #tpu.dot_dimension_numbers<[1], [0], [0], [1], [0, 0, 1, 1], [], []>} : vector<16x60xf32>, vector<60x240xf32>, vector<16x240xf32> -> vector<16x240xf32>
    %c0_85 = arith.constant 0 : index
    %c0_86 = arith.constant 0 : index
    %154 = vector.load %arg8[%c0_85, %c0_86] : memref<1x240xf32, #tpu.memory_space<vmem>>, vector<1x240xf32>
    %155 = vector.broadcast %154 : vector<1x240xf32> to vector<16x240xf32>
    %156 = arith.addf %153, %155 : vector<16x240xf32>
    %cst_87 = arith.constant 0.000000e+00 : f32
    %157 = vector.broadcast %cst_87 : f32 to vector<16x240xf32>
    %158 = arith.maximumf %156, %157 : vector<16x240xf32>
    %c0_88 = arith.constant 0 : index
    %c0_89 = arith.constant 0 : index
    %159 = vector.load %arg9[%c0_88, %c0_89] : memref<240x60xf32, #tpu.memory_space<vmem>>, vector<240x60xf32>
    %cst_90 = arith.constant dense<0.000000e+00> : vector<16x60xf32>
    %160 = tpu.matmul %158, %159, %cst_90 {dimension_numbers = #tpu.dot_dimension_numbers<[1], [0], [0], [1], [0, 0, 1, 1], [], []>} : vector<16x240xf32>, vector<240x60xf32>, vector<16x60xf32> -> vector<16x60xf32>
    %c0_91 = arith.constant 0 : index
    %c0_92 = arith.constant 0 : index
    %161 = vector.load %arg10[%c0_91, %c0_92] : memref<1x60xf32, #tpu.memory_space<vmem>>, vector<1x60xf32>
    %162 = vector.broadcast %161 : vector<1x60xf32> to vector<16x60xf32>
    %163 = arith.addf %160, %162 : vector<16x60xf32>
    %164 = arith.addf %129, %163 : vector<16x60xf32>
    %165 = vector.shape_cast %164 : vector<16x60xf32> to vector<2x8x60xf32>
    %c0_93 = arith.constant 0 : index
    %c0_94 = arith.constant 0 : index
    %c0_95 = arith.constant 0 : index
    %166 = vector.load %arg15[%c0_93, %c0_94, %c0_95] : memref<2x8x60xf32, #tpu.memory_space<vmem>>, vector<2x8x60xf32>
    tpu.vector_store %arg15[%c0_93, %c0_94, %c0_95], %165 {strides = array<i32>} : memref<2x8x60xf32, #tpu.memory_space<vmem>>, vector<2x8x60xf32>,
    return
  }
  func.func @transform_0(%arg0: i32) -> (i32, i32, i32) {
    %c0_i32 = arith.constant 0 : i32
    %c0_i32_0 = arith.constant 0 : i32
    %c0_i32_1 = arith.constant 0 : i32
    %c0_i32_2 = arith.constant 0 : i32
    return %c0_i32, %c0_i32_0, %c0_i32_1 : i32, i32, i32
  }
  func.func @transform_1(%arg0: i32) -> (i32, i32, i32) {
    %c0_i32 = arith.constant 0 : i32
    %c0_i32_0 = arith.constant 0 : i32
    %c0_i32_1 = arith.constant 0 : i32
    %c0_i32_2 = arith.constant 0 : i32
    return %c0_i32, %c0_i32_0, %c0_i32_1 : i32, i32, i32
  }
  func.func @transform_2(%arg0: i32) -> (i32, i32, i32) {
    %c0_i32 = arith.constant 0 : i32
    %c0_i32_0 = arith.constant 0 : i32
    %c0_i32_1 = arith.constant 0 : i32
    %c0_i32_2 = arith.constant 0 : i32
    return %c0_i32, %c0_i32_0, %c0_i32_1 : i32, i32, i32
  }
  func.func @transform_3(%arg0: i32) -> (i32, i32, i32) {
    %c0_i32 = arith.constant 0 : i32
    %c0_i32_0 = arith.constant 0 : i32
    %c0_i32_1 = arith.constant 0 : i32
    %c0_i32_2 = arith.constant 0 : i32
    return %c0_i32, %c0_i32_0, %c0_i32_1 : i32, i32, i32
  }
  func.func @transform_4(%arg0: i32) -> (i32, i32, i32) {
    %c0_i32 = arith.constant 0 : i32
    %c0_i32_0 = arith.constant 0 : i32
    %c0_i32_1 = arith.constant 0 : i32
    %c0_i32_2 = arith.constant 0 : i32
    return %c0_i32, %c0_i32_0, %c0_i32_1 : i32, i32, i32
  }
  func.func @transform_5(%arg0: i32) -> (i32, i32) {
    %c0_i32 = arith.constant 0 : i32
    %c0_i32_0 = arith.constant 0 : i32
    %c0_i32_1 = arith.constant 0 : i32
    return %c0_i32, %c0_i32_0 : i32, i32
  }
  func.func @transform_6(%arg0: i32) -> (i32, i32) {
    %c0_i32 = arith.constant 0 : i32
    %c0_i32_0 = arith.constant 0 : i32
    %c0_i32_1 = arith.constant 0 : i32
    return %c0_i32, %c0_i32_0 : i32, i32
  }
  func.func @transform_7(%arg0: i32) -> (i32, i32) {
    %c0_i32 = arith.constant 0 : i32
    %c0_i32_0 = arith.constant 0 : i32
    %c0_i32_1 = arith.constant 0 : i32
    return %c0_i32, %c0_i32_0 : i32, i32
  }
  func.func @transform_8(%arg0: i32) -> (i32, i32) {
    %c0_i32 = arith.constant 0 : i32
    %c0_i32_0 = arith.constant 0 : i32
    %c0_i32_1 = arith.constant 0 : i32
    return %c0_i32, %c0_i32_0 : i32, i32
  }
  func.func @transform_9(%arg0: i32) -> (i32, i32) {
    %c0_i32 = arith.constant 0 : i32
    %c0_i32_0 = arith.constant 0 : i32
    %c0_i32_1 = arith.constant 0 : i32
    return %c0_i32, %c0_i32_0 : i32, i32
  }
  func.func @transform_10(%arg0: i32) -> (i32, i32) {
    %c0_i32 = arith.constant 0 : i32
    %c0_i32_0 = arith.constant 0 : i32
    %c0_i32_1 = arith.constant 0 : i32
    return %c0_i32, %c0_i32_0 : i32, i32
  }
  func.func @transform_11(%arg0: i32) -> (i32, i32) {
    %c0_i32 = arith.constant 0 : i32
    %c0_i32_0 = arith.constant 0 : i32
    %c0_i32_1 = arith.constant 0 : i32
    return %c0_i32, %c0_i32_0 : i32, i32
  }
  func.func @transform_12(%arg0: i32) -> (i32, i32) {
    %c0_i32 = arith.constant 0 : i32
    %c0_i32_0 = arith.constant 0 : i32
    %c0_i32_1 = arith.constant 0 : i32
    return %c0_i32, %c0_i32_0 : i32, i32
  }
  func.func @transform_13(%arg0: i32) -> (i32, i32) {
    %c0_i32 = arith.constant 0 : i32
    %c0_i32_0 = arith.constant 0 : i32
    %c0_i32_1 = arith.constant 0 : i32
    return %c0_i32, %c0_i32_0 : i32, i32
  }
  func.func @transform_14(%arg0: i32) -> (i32, i32, i32) {
    %c0_i32 = arith.constant 0 : i32
    %c0_i32_0 = arith.constant 0 : i32
    %c0_i32_1 = arith.constant 0 : i32
    %c0_i32_2 = arith.constant 0 : i32
    return %c0_i32, %c0_i32_0, %c0_i32_1 : i32, i32, i32
  }
}

</mosaic_0001>

<bundles_post_ra>
// kernel: tpu_custom_call.1
= control target key start
LH: loop header
LB: loop body
LE: loop exit
PB: predicated region body
PF: predicated region fallthrough
CT: control target
= control target key end

     0   :  { %vm52_vm0 = vcmask 490496   ;;  %s4012_s0 = inlined_call_operand.vmem [shape: f32[2,8,60], index: 0, kind: input, shape index: {}]   ;;  %s4013_s1 = inlined_call_operand.vmem [shape: f32[3,60,20], index: 1, kind: input, shape index: {}]   ;;  %s4014_s2 = inlined_call_operand.vmem [shape: f32[3,60,20], index: 2, kind: input, shape index: {}]   ;;  %s4015_s3 = inlined_call_operand.vmem [shape: f32[3,60,20], index: 3, kind: input, shape index: {}]   ;;  %s4016_s4 = inlined_call_operand.vmem [shape: f32[3,20,60], index: 4, kind: input, shape index: {}]   ;;  %s4017_s5 = inlined_call_operand.vmem [shape: f32[1,60], index: 5, kind: input, shape index: {}]   ;;  %s4018_s6 = inlined_call_operand.vmem [shape: f32[60,240], index: 6, kind: input, shape index: {}]   ;;  %s4019_s7 = inlined_call_operand.vmem [shape: f32[1,240], index: 7, kind: input, shape index: {}]   ;;  %s4020_s8 = inlined_call_operand.vmem [shape: f32[240,60], index: 8, kind: input, shape index: {}]   ;;  %s4021_s9 = inlined_call_operand.vmem [shape: f32[1,60], index: 9, kind: input, shape index: {}]   ;;  %s4022_s10 = inlined_call_operand.vmem [shape: f32[1,60], index: 10, kind: input, shape index: {}]   ;;  %s4023_s11 = inlined_call_operand.vmem [shape: f32[1,60], index: 11, kind: input, shape index: {}]   ;;  %s4024_s12 = inlined_call_operand.vmem [shape: f32[1,60], index: 12, kind: input, shape index: {}]   ;;  %s4025_s13 = inlined_call_operand.vmem [shape: f32[1,60], index: 13, kind: input, shape index: {}]   ;;  %s4026_s14 = inlined_call_operand.hbm [shape: f32[2,8,60], index: 14, kind: output, shape index: {}]  }
   0x1   :  { %v3334_v0 = vld [vmem:[%s4012_s0] sm:$0xff]  ;;  %v3339_v1 = vld [vmem:[%s4012_s0 + $0x8] sm:$0xff] }
   0x2   :  { %19 = vsyncpa [#allocation3], 0  ;;  %v53_v2 = vsel %vm52_vm0, %v3334_v0, 0.0  ;;  %v56_v3 = vsel %vm52_vm0, %v3339_v1, 0.0  ;;  %v101_v14 = vld [vmem:[%s4013_s1] sm:$0xff]  ;;  %v102_v15 = vld [vmem:[%s4013_s1 + $0x8] sm:$0xff] }
   0x3   :  { %54 = vadd.xlane.f32.xlu0 %v53_v2  ;;  %v2945_v16 = vpack.c.bf16 %v102_v15, %v101_v14  ;;  %v103_v17 = vld [vmem:[%s4013_s1 + $0x10] sm:$0xff]  ;;  %v104_v18 = vld [vmem:[%s4013_s1 + $0x18] sm:$0xff]  ;;  %v105_v20 = vld [vmem:[%s4013_s1 + $0x20] sm:$0xff]  ;;  %vm115_vm1 = vcmask 1043456   ;;  %vm3249_vm2 = vmmov 1   ;;  %vm3251_vm4 = vmmov 0  }
   0x4   :  { %v2949_v19 = vpack.c.bf16 %v104_v18, %v103_v17  ;;  %v106_v21 = vld [vmem:[%s4013_s1 + $0x28] sm:$0xff]  ;;  %v107_v23 = vld [vmem:[%s4013_s1 + $0x30] sm:$0xff]  ;;  %v108_v24 = vld [vmem:[%s4013_s1 + $0x38] sm:$0xf]  ;;  %vm366_vm5 = vcmask 162816   ;;  %vm523_vm7 = vcmask 64512  }
   0x5   :  { %2946 = vmatprep.subr.bf16.mxu1 %v2945_v16  ;;  %v2953_v22 = vpack.c.bf16 %v106_v21, %v105_v20  ;;  %v2957_v25 = vpack.c.bf16 %v108_v24, %v107_v23  ;;  %vm3374_vm3 = vmpackc.low %vm115_vm1, %vm3249_vm2  ;;  %v194_v27 = vld [vmem:[%s4014_s2] sm:$0xff]  ;;  %v195_v28 = vld [vmem:[%s4014_s2 + $0x8] sm:$0xff]  ;;  %vm2336_vm8 = vcmask 916480   ;;  %s3253_s26 = smov [#allocation2]  }
   0x6   :  { %2948 = vmatpush3.bf16.msra.mxu1 %v2945_v16  ;;  %v2963_v29 = vpack.c.bf16 %v195_v28, %v194_v27  ;;  %v2438_v37 = vld [vmem:[%s4022_s10] ss:$0 sm:$0xff]  ;;  %v196_v44 = vld [vmem:[%s4014_s2 + $0x10] sm:$0xff]  ;;  %v197_v45 = vld [vmem:[%s4014_s2 + $0x18] sm:$0xff]  ;;  %s2427_s10 = sshll.u32 %s3253_s26, 4  ;;  %s2428_s10 = int_to_ptr.vmem [resolvable:$true] %s2427_s10 }
   0x7   :  { %57 = vadd.xlane.f32.xlu0 %v56_v3  ;;  %2950 = vmatprep.subr.bf16.mxu1 %v2949_v19  ;;  %v2439_v39 = vld [vmem:[%s4023_s11] ss:$0 sm:$0xff]  ;;  %v2967_v48 = vpack.c.bf16 %v197_v45, %v196_v44  ;;  %v199_v50 = vld [vmem:[%s4014_s2 + $0x28] sm:$0xff]  ;;  %v200_v52 = vld [vmem:[%s4014_s2 + $0x30] sm:$0xff]  ;;  %s3225_s11 = scalar_lea.vmem %s2428_s10, 256  ;;  %p3230_p1 = scmp.lt.s32.totalorder %s2428_s10, %s2428_s10 }
   0x8   :  { %v198_v49 = vld [vmem:[%s4014_s2 + $0x20] sm:$0xff]  ;;  %v201_v53 = vld [vmem:[%s4014_s2 + $0x38] sm:$0xf]  ;;  %v281_v56 = vld [vmem:[%s4015_s3 + $0x8] sm:$0xff]  ;;  %p3226_p0 = scmp.ne.s32.totalorder %s2428_s10, %s3225_s11  ;;  %p3231_p2 = scmp.lt.s32.totalorder %s3225_s11, %s3225_s11 }
   0x9   :  { %v2971_v51 = vpack.c.bf16 %v199_v50, %v198_v49  ;;  %v2975_v54 = vpack.c.bf16 %v201_v53, %v200_v52  ;;  %v280_v55 = vld [vmem:[%s4015_s3] sm:$0xff]  ;;  %v282_v58 = vld [vmem:[%s4015_s3 + $0x10] sm:$0xff]  ;;  %v283_v59 = vld [vmem:[%s4015_s3 + $0x18] sm:$0xff] }
   0xa   :  { %2952 = vmatpush3.bf16.msra.mxu1 %v2949_v19  ;;  %v2981_v57 = vpack.c.bf16 %v281_v56, %v280_v55  ;;  %v2985_v60 = vpack.c.bf16 %v283_v59, %v282_v58  ;;  %v284_v61 = vld [vmem:[%s4015_s3 + $0x20] sm:$0xff]  ;;  %v285_v62 = vld [vmem:[%s4015_s3 + $0x28] sm:$0xff]  ;;  %v286_v2 = vld [vmem:[%s4015_s3 + $0x30] sm:$0xff]  ;;  %p3232_p3 = por %p3231_p2, %p3230_p1 }
   0xb   :  { %2954 = vmatprep.subr.bf16.mxu1 %v2953_v22  ;;  %v2989_v63 = vpack.c.bf16 %v285_v62, %v284_v61  ;;  %v287_v3 = vld [vmem:[%s4015_s3 + $0x38] sm:$0xf]  ;;  %v2459_v16 = vld [vmem:[%s4013_s1 + $0x60] sm:$0xff]  ;;  %v2460_v17 = vld [vmem:[%s4013_s1 + $0x68] sm:$0xff] }
   0xc   :  { %v3007_v18 = vpack.c.bf16 %v2460_v17, %v2459_v16  ;;  %v2461_v19 = vld [vmem:[%s4013_s1 + $0x70] sm:$0xff]  ;;  %v2462_v20 = vld [vmem:[%s4013_s1 + $0x78] sm:$0xf]  ;;  %v2478_v23 = vld [vmem:[%s4015_s3 + $0x48] sm:$0xff]  ;;  %p3233_p4 = pnand %p3232_p3, %p3226_p0 }
   0xd   :  { %v3011_v21 = vpack.c.bf16 %v2462_v20, %v2461_v19  ;;  %v2479_v27 = vld [vmem:[%s4015_s3 + $0x50] sm:$0xff]  ;;  %v2480_v28 = vld [vmem:[%s4015_s3 + $0x58] sm:$0xff]  ;;  %v2470_v16 = vld [vmem:[%s4014_s2 + $0x60] sm:$0xff] }
   0xe   :  { %2956 = vmatpush3.bf16.msra.mxu1 %v2953_v22  ;;  %v2477_v22 = vld [vmem:[%s4015_s3 + $0x40] sm:$0xff]  ;;  %v2471_v17 = vld [vmem:[%s4014_s2 + $0x68] sm:$0xff]  ;;  %v2472_v19 = vld [vmem:[%s4014_s2 + $0x70] sm:$0xff] }
   0xf   :  { %2959 = vmatprep.subr.msk.bf16.mxu1 %vm3374_vm3, %v2957_v25  ;;  %v3035_v24 = vpack.c.bf16 %v2478_v23, %v2477_v22  ;;  %v2473_v20 = vld [vmem:[%s4014_s2 + $0x78] sm:$0xf] }
  0x10   :  { %v2302_v26 = vld [vmem:[%s4020_s8 + $0x18] sm:$0xff] }
  0x12   :  { %2962 = vmatpush3.bf16.msk.msra.mxu1 %vm3374_vm3, %v2957_v25 }
  0x13   :  { %2964 = vmatprep.subr.bf16.mxu1 %v2963_v29 }
  0x90   :  { %v55_v4 = vpop.xlane.xlu0 %54 }
  0x91   :  { %v60_v5 = vmul.f32 0.016666668, %v55_v4  ;;  %v2993_v4 = vpack.c.bf16 %v287_v3, %v286_v2 }
  0x93   :  { %v62_v6 = vsub.f32 %v3334_v0, %v60_v5  ;;  %v3250_v5 = vmov 0.0  }
  0x94   :  { %v58_v7 = vpop.xlane.xlu0 %57  ;;  %2744 = vmatprep.subr.mxu0 %v3250_v5  ;;  %2746 = vmatprep.mubr.msk.f32.mxu0 %vm3251_vm4, %v3250_v5 }
  0x95   :  { %v61_v8 = vmul.f32 0.016666668, %v58_v7  ;;  %v64_v9 = vmul.f32 %v62_v6, %v62_v6 }
  0x97   :  { %v63_v10 = vsub.f32 %v3339_v1, %v61_v8  ;;  %v66_v11 = vsel %vm52_vm0, %v64_v9, 0.0  ;;  %v2455_v8 = vld [vmem:[%s4013_s1 + $0x40] sm:$0xff]  ;;  %v2456_v9 = vld [vmem:[%s4013_s1 + $0x48] sm:$0xff] }
  0x98   :  { %67 = vadd.xlane.f32.xlu1 %v66_v11 }
  0x99   :  { %v65_v12 = vmul.f32 %v63_v10, %v63_v10 }
  0x9b   :  { %v69_v13 = vsel %vm52_vm0, %v65_v12, 0.0  ;;  %v2457_v12 = vld [vmem:[%s4013_s1 + $0x50] sm:$0xff] }
  0x9c   :  { %70 = vadd.xlane.f32.xlu1 %v69_v13  ;;  %v2458_v13 = vld [vmem:[%s4013_s1 + $0x58] sm:$0xff] }
  0x9d   :  { %v3003_v15 = vpack.c.bf16 %v2458_v13, %v2457_v12  ;;  %v2468_v12 = vld [vmem:[%s4014_s2 + $0x50] sm:$0xff]  ;;  %v2469_v13 = vld [vmem:[%s4014_s2 + $0x58] sm:$0xff] }
 0x125   :  { %v68_v30 = vpop.xlane.xlu1 %67 }
 0x126   :  { %v72_v31 = vmul.f32 0.016666668, %v68_v30  ;;  %v3039_v30 = vpack.c.bf16 %v2480_v28, %v2479_v27 }
 0x128   :  { %v74_v32 = vadd.f32 1e-05, %v72_v31  ;;  %v2481_v31 = vld [vmem:[%s4015_s3 + $0x60] sm:$0xff] }
 0x129   :  { %v71_v33 = vpop.xlane.xlu1 %70 }
 0x12a   :  { %3193 = vrsqrt.f32 %v74_v32  ;;  %v73_v34 = vmul.f32 0.016666668, %v71_v33  ;;  %v2482_v32 = vld [vmem:[%s4015_s3 + $0x68] sm:$0xff] }
 0x12b   :  { %v3043_v33 = vpack.c.bf16 %v2482_v32, %v2481_v31 }
 0x12c   :  { %v75_v35 = vadd.f32 1e-05, %v73_v34  ;;  %v2483_v34 = vld [vmem:[%s4015_s3 + $0x70] sm:$0xff] }
 0x12e   :  { %3195 = vrsqrt.f32 %v75_v35  ;;  %v2484_v35 = vld [vmem:[%s4015_s3 + $0x78] sm:$0xf] }
 0x134   :  { %v3194_v36 = vpop.eup %3193 }
 0x135   :  { %v78_v38 = vmul.f32 %v3194_v36, %v62_v6  ;;  %v3047_v36 = vpack.c.bf16 %v2484_v35, %v2483_v34 }
 0x137   :  { %v86_v40 = vmul.f32 %v2438_v37, %v78_v38 }
 0x138   :  { %v3196_v41 = vpop.eup %3195 }
 0x139   :  { %v3394_v42 = vadd.f32 %v2439_v39, %v86_v40  ;;  %v79_v43 = vmul.f32 %v3196_v41, %v63_v10  ;;  %v2999_v10 = vpack.c.bf16 %v2456_v9, %v2455_v8 }
 0x13b   :  { %v87_v46 = vmul.f32 %v2438_v37, %v79_v43  ;;  %2703 = vmatprep.mubr.msk.f32.mxu1 %vm52_vm0, %v3394_v42  ;;  %v96_v37 = vlaneseq }
 0x13d   :  { %v3404_v47 = vadd.f32 %v2439_v39, %v87_v46  ;;  %v3540_v38 = vshrl.u32 %v96_v37, 7  ;;  %v99_v39 = vand.u32 127, %v96_v37 }
 0x13f   :  { %2704 = vmatmul.mubr.msk.f32.vlgmr.msra.gmra.mrb[0].mxu1 %vm52_vm0, %v3404_v47  ;;  %vm3543_vm6 = vcmp.ge.s32.totalorder %v3540_v38, %v99_v39 }
 0x140   :  { %2966 = vmatpush3.bf16.msra.mxu1 %v2963_v29  ;;  %2722 = vmatprep.mubr.msk.f32.mxu1 %vm52_vm0, %v3394_v42 }
 0x141   :  { %2968 = vmatprep.subr.bf16.mxu1 %v2967_v48 }
 0x144   :  { %2970 = vmatpush3.bf16.msra.mxu1 %v2967_v48 }
 0x145   :  { %2972 = vmatprep.subr.bf16.mxu1 %v2971_v51 }
 0x148   :  { %2974 = vmatpush3.bf16.msra.mxu1 %v2971_v51 }
 0x149   :  { %2977 = vmatprep.subr.msk.bf16.mxu1 %vm3374_vm3, %v2975_v54 }
 0x14c   :  { %2980 = vmatpush3.bf16.msk.msra.mxu1 %vm3374_vm3, %v2975_v54 }
 0x14d   :  { %2982 = vmatprep.subr.bf16.mxu1 %v2981_v57 }
 0x14f   :  { %2723 = vmatmul.mubr.msk.f32.vlgmr.msra.gmra.mrb[2].mxu1 %vm52_vm0, %v3404_v47 }
 0x150   :  { %2984 = vmatpush3.bf16.msra.mxu1 %v2981_v57  ;;  %2741 = vmatprep.mubr.msk.f32.mxu1 %vm52_vm0, %v3394_v42 }
 0x151   :  { %2986 = vmatprep.subr.bf16.mxu1 %v2985_v60 }
 0x154   :  { %2988 = vmatpush3.bf16.msra.mxu1 %v2985_v60 }
 0x155   :  { %2990 = vmatprep.subr.bf16.mxu1 %v2989_v63 }
 0x158   :  { %2992 = vmatpush3.bf16.msra.mxu1 %v2989_v63 }
 0x159   :  { %2995 = vmatprep.subr.msk.bf16.mxu1 %vm3374_vm3, %v2993_v4 }
 0x15c   :  { %2998 = vmatpush3.bf16.msk.msra.mxu1 %vm3374_vm3, %v2993_v4 }
 0x15d   :  { %2749 = vmatprep.subr.mxu1 %v3250_v5 }
 0x15f   :  { %2742 = vmatmul.mubr.msk.f32.vlgmr.msra.gmra.mrb[4].mxu1 %vm52_vm0, %v3404_v47 }
 0x160   :  { %2751 = vmatprep.mubr.msk.f32.mxu1 %vm3251_vm4, %v3250_v5 }
 0x212   :  { %v2705_v6 = vpop.f32.mrb[0].mxu1 }
 0x213   :  { %v185_v7 = vpop.f32.mrb[1].mxu1 }
 0x222   :  { %v2724_v11 = vpop.f32.mrb[2].mxu1 }
 0x223   :  { %v271_v14 = vpop.f32.mrb[3].mxu1  ;;  %2750 = vmatpush3.xpose.msk.msra.mxu1 %vm366_vm5, %v2724_v11 }
 0x224   :  { %2745 = vmatpush3.xpose.msk.msra.mxu0 %vm366_vm5, %v271_v14  ;;  %2754 = vmatprep.subr.mxu1 %v3250_v5 }
 0x225   :  { %3000 = vmatprep.subr.bf16.mxu0 %v2999_v10 }
 0x226   :  { %2752 = vmatmul.mubr.msk.f32.vlgmr.msra.gmra.mrb[6].mxu1 %vm366_vm5, %v2705_v6  ;;  %v2466_v6 = vld [vmem:[%s4014_s2 + $0x40] sm:$0xff] }
 0x227   :  { %2747 = vmatmul.mubr.msk.f32.vlgmr.msra.gmra.mrb[0].mxu0 %vm366_vm5, %v185_v7  ;;  %2756 = vmatprep.mubr.msk.f32.mxu1 %vm3251_vm4, %v3250_v5  ;;  %v2467_v7 = vld [vmem:[%s4014_s2 + $0x48] sm:$0xff] }
 0x228   :  { %3002 = vmatpush3.bf16.msra.mxu0 %v2999_v10  ;;  %2780 = vmatprep.mubr.msk.f32.mxu0 %vm52_vm0, %v3394_v42  ;;  %v3017_v10 = vpack.c.bf16 %v2467_v7, %v2466_v6  ;;  %v2507_v6 = vld [vmem:[%s4013_s1 + $0xa0] sm:$0xff]  ;;  %v2508_v7 = vld [vmem:[%s4013_s1 + $0xa8] sm:$0xff] }
 0x229   :  { %3004 = vmatprep.subr.bf16.mxu0 %v3003_v15 }
 0x22c   :  { %3006 = vmatpush3.bf16.msra.mxu0 %v3003_v15  ;;  %v3021_v15 = vpack.c.bf16 %v2469_v13, %v2468_v12  ;;  %v2526_v12 = vld [vmem:[%s4015_s3 + $0x88] sm:$0xff] }
 0x22d   :  { %3008 = vmatprep.subr.bf16.mxu0 %v3007_v18 }
 0x230   :  { %3010 = vmatpush3.bf16.msra.mxu0 %v3007_v18  ;;  %v3025_v18 = vpack.c.bf16 %v2471_v17, %v2470_v16  ;;  %v2529_v17 = vld [vmem:[%s4015_s3 + $0xa0] sm:$0xff] }
 0x231   :  { %3013 = vmatprep.subr.msk.bf16.mxu0 %vm3374_vm3, %v3011_v21 }
 0x232   :  { %v3507_v25 = vpop.f32.mrb[4].mxu1 }
 0x233   :  { %v357_v29 = vpop.f32.mrb[5].mxu1 }
 0x234   :  { %2755 = vmatpush3.msra.mxu1 %v357_v29  ;;  %3016 = vmatpush3.bf16.msk.msra.mxu0 %vm3374_vm3, %v3011_v21  ;;  %v3029_v21 = vpack.c.bf16 %v2473_v20, %v2472_v19  ;;  %v2531_v20 = vld [vmem:[%s4015_s3 + $0xb0] sm:$0xff] }
 0x235   :  { %3036 = vmatprep.subr.bf16.mxu0 %v3035_v24  ;;  %2759 = vmatprep.subr.mxu1 %v3250_v5 }
 0x237   :  { %2781 = vmatmul.mubr.msk.f32.vlgmr.msra.gmra.mrb[2].mxu0 %vm52_vm0, %v3404_v47 }
 0x238   :  { %3038 = vmatpush3.bf16.msra.mxu0 %v3035_v24  ;;  %2818 = vmatprep.mubr.msk.f32.mxu0 %vm52_vm0, %v3394_v42 }
 0x239   :  { %3040 = vmatprep.subr.bf16.mxu0 %v3039_v30 }
 0x23c   :  { %3042 = vmatpush3.bf16.msra.mxu0 %v3039_v30 }
 0x23d   :  { %3044 = vmatprep.subr.bf16.mxu0 %v3043_v33 }
 0x240   :  { %3046 = vmatpush3.bf16.msra.mxu0 %v3043_v33 }
 0x241   :  { %3049 = vmatprep.subr.msk.bf16.mxu0 %vm3374_vm3, %v3047_v36 }
 0x244   :  { %3052 = vmatpush3.bf16.msk.msra.mxu0 %vm3374_vm3, %v3047_v36 }
 0x247   :  { %2819 = vmatmul.mubr.msk.f32.vlgmr.msra.gmra.mrb[4].mxu0 %vm52_vm0, %v3404_v47 }
 0x2f9   :  { %v515_v41 = vpop.f32.mrb[6].mxu1 }
 0x2fa   :  { %v522_v43 = vsel %vm3543_vm6, %v515_v41, -inf  ;;  %v439_v44 = vpop.f32.mrb[0].mxu0  ;;  %v2753_v45 = vpop.f32.mrb[7].mxu1 }
 0x2fb   :  { %v521_v46 = vsel %vm3543_vm6, %v439_v44, -inf  ;;  %v2748_v48 = vpop.f32.mrb[1].mxu0  ;;  %v527_v49 = vsel %vm523_vm7, %v522_v43, -inf }
 0x2fc   :  { %528 = vmax.xlane.f32.xlu1 %v527_v49  ;;  %v524_v50 = vsel %vm523_vm7, %v521_v46, -inf }
 0x2fd   :  { %525 = vmax.xlane.f32.xlu0 %v524_v50 }
 0x30a   :  { %v3553_v51 = vpop.f32.mrb[2].mxu0 }
 0x30b   :  { %v773_v52 = vpop.f32.mrb[3].mxu0 }
 0x31a   :  { %v3555_v53 = vpop.f32.mrb[4].mxu0 }
 0x31b   :  { %v3557_v54 = vpop.f32.mrb[5].mxu0 }
 0x389   :  { %v529_v55 = vpop.xlane.xlu1 %528 }
 0x38a   :  { %v531_v56 = vsub.f32 %v522_v43, %v529_v55  ;;  %v526_v57 = vpop.xlane.xlu0 %525 }
 0x38b   :  { %v530_v58 = vsub.f32 %v521_v46, %v526_v57  ;;  %v2503_v57 = vld [vmem:[%s4013_s1 + $0x80] sm:$0xff] }
 0x38c   :  { %v534_v59 = vmul.f32 1.442695, %v531_v56 }
 0x38d   :  { %v532_v60 = vmul.f32 1.442695, %v530_v58  ;;  %v2504_v58 = vld [vmem:[%s4013_s1 + $0x88] sm:$0xff] }
 0x38e   :  { %3197 = vpow2.f32 %v534_v59 }
 0x38f   :  { %3199 = vpow2.f32 %v532_v60 }
 0x398   :  { %v3198_v61 = vpop.eup %3197 }
 0x399   :  { %v3200_v62 = vpop.eup %3199  ;;  %v539_v63 = vsel %vm523_vm7, %v3198_v61, 0.0 }
 0x39a   :  { %540 = vadd.xlane.f32.xlu1 %v539_v63  ;;  %v536_v2 = vsel %vm523_vm7, %v3200_v62, 0.0  ;;  %v2506_v63 = vld [vmem:[%s4013_s1 + $0x98] sm:$0xff] }
 0x39b   :  { %537 = vadd.xlane.f32.xlu0 %v536_v2 }
 0x427   :  { %v541_v3 = vpop.xlane.xlu1 %540 }
 0x428   :  { %v538_v4 = vpop.xlane.xlu0 %537 }
 0x429   :  { %3201 = vrcp.f32 %v538_v4 }
 0x42a   :  { %3203 = vrcp.f32 %v541_v3 }
 0x433   :  { %v3202_v8 = vpop.eup %3201 }
 0x434   :  { %v544_v9 = vmul.f32 %v3202_v8, %v3200_v62  ;;  %v3204_v11 = vpop.eup %3203  ;;  %v2505_v62 = vld [vmem:[%s4013_s1 + $0x90] sm:$0xff] }
 0x435   :  { %v545_v14 = vmul.f32 %v3204_v11, %v3198_v61  ;;  %v3061_v61 = vpack.c.bf16 %v2504_v58, %v2503_v57  ;;  %v3065_v4 = vpack.c.bf16 %v2506_v63, %v2505_v62  ;;  %v2509_v8 = vld [vmem:[%s4013_s1 + $0xb0] sm:$0xff]  ;;  %v2525_v11 = vld [vmem:[%s4015_s3 + $0x80] sm:$0xff] }
 0x436   :  { %2757 = vmatmul.mubr.msk.f32.vlgmr.msra.gmra.mrb[8].mxu1 %vm523_vm7, %v544_v9  ;;  %v2510_v9 = vld [vmem:[%s4013_s1 + $0xb8] sm:$0xf]  ;;  %v3097_v13 = vpack.c.bf16 %v2526_v12, %v2525_v11 }
 0x437   :  { %2760 = vmatpush3.msra.mxu1 %v3507_v25  ;;  %2761 = vmatprep.mubr.msk.f32.mxu1 %vm3251_vm4, %v3250_v5 }
 0x438   :  { %3018 = vmatprep.subr.bf16.mxu1 %v3017_v10 }
 0x43a   :  { %2762 = vmatmul.mubr.msk.f32.vlgmr.msra.gmra.mrb[10].mxu1 %vm523_vm7, %v545_v14  ;;  %v2527_v14 = vld [vmem:[%s4015_s3 + $0x90] sm:$0xff] }
 0x43b   :  { %3020 = vmatpush3.bf16.msra.mxu1 %v3017_v10  ;;  %2799 = vmatprep.mubr.msk.f32.mxu1 %vm52_vm0, %v3394_v42  ;;  %v3073_v10 = vpack.c.bf16 %v2510_v9, %v2509_v8  ;;  %v2542_v9 = vld [vmem:[%s4016_s4 + $0x30] sm:$0xff] }
 0x43c   :  { %3022 = vmatprep.subr.bf16.mxu1 %v3021_v15 }
 0x43f   :  { %3024 = vmatpush3.bf16.msra.mxu1 %v3021_v15  ;;  %v2528_v15 = vld [vmem:[%s4015_s3 + $0x98] sm:$0xff] }
 0x440   :  { %3026 = vmatprep.subr.bf16.mxu1 %v3025_v18  ;;  %v3101_v16 = vpack.c.bf16 %v2528_v15, %v2527_v14 }
 0x443   :  { %3028 = vmatpush3.bf16.msra.mxu1 %v3025_v18  ;;  %v2530_v18 = vld [vmem:[%s4015_s3 + $0xa8] sm:$0xff] }
 0x444   :  { %3031 = vmatprep.subr.msk.bf16.mxu1 %vm3374_vm3, %v3029_v21  ;;  %v3105_v19 = vpack.c.bf16 %v2530_v18, %v2529_v17  ;;  %v2544_v18 = vld [vmem:[%s4016_s4 + $0x40] sm:$0xf] }
 0x447   :  { %3034 = vmatpush3.bf16.msk.msra.mxu1 %vm3374_vm3, %v3029_v21  ;;  %v2532_v21 = vld [vmem:[%s4015_s3 + $0xb8] sm:$0xf] }
 0x448   :  { %2821 = vmatprep.subr.mxu1 %v3250_v5 }
 0x44a   :  { %2800 = vmatmul.mubr.msk.f32.vlgmr.msra.gmra.mrb[12].mxu1 %vm52_vm0, %v3404_v47 }
 0x44b   :  { %2823 = vmatprep.mubr.msk.f32.mxu1 %vm3251_vm4, %v3250_v5 }
 0x509   :  { %v3601_v22 = vpop.f32.mrb[8].mxu1 }
 0x50a   :  { %v2758_v23 = vpop.f32.mrb[9].mxu1 }
 0x50b   :  { %v3109_v23 = vpack.c.bf16 %v2532_v21, %v2531_v20 }
 0x50d   :  { %v3603_v24 = vpop.f32.mrb[10].mxu1 }
 0x50e   :  { %v2763_v25 = vpop.f32.mrb[11].mxu1 }
 0x50f   :  { %v2496_v25 = vld [vmem:[%s4016_s4 + $0x28] sm:$0xf] }
 0x51d   :  { %v2801_v27 = vpop.f32.mrb[12].mxu1 }
 0x51e   :  { %v860_v28 = vpop.f32.mrb[13].mxu1 }
 0x51f   :  { %2822 = vmatpush3.xpose.msk.msra.mxu1 %vm366_vm5, %v860_v28  ;;  %v693_v28 = vld [vmem:[%s4016_s4 + $0x8] sm:$0xff] }
 0x520   :  { %2826 = vmatprep.subr.mxu1 %v3250_v5 }
 0x522   :  { %2824 = vmatmul.mubr.msk.f32.vlgmr.msra.gmra.mrb[14].mxu1 %vm366_vm5, %v773_v52  ;;  %v2495_v52 = vld [vmem:[%s4016_s4 + $0x20] sm:$0xff] }
 0x523   :  { %2827 = vmatpush3.xpose.msk.msra.mxu1 %vm366_vm5, %v2801_v27  ;;  %2828 = vmatprep.mubr.msk.f32.mxu1 %vm3251_vm4, %v3250_v5  ;;  %v692_v27 = vld [vmem:[%s4016_s4] sm:$0xff] }
 0x524   :  { %2831 = vmatprep.subr.mxu1 %v3250_v5 }
 0x526   :  { %2829 = vmatmul.mubr.msk.f32.vlgmr.msra.gmra.mrb[16].mxu1 %vm366_vm5, %v3553_v51  ;;  %v2494_v51 = vld [vmem:[%s4016_s4 + $0x18] sm:$0xff] }
 0x527   :  { %2832 = vmatpush3.msra.mxu1 %v3557_v54  ;;  %2833 = vmatprep.mubr.msk.f32.mxu1 %vm3251_vm4, %v3250_v5  ;;  %v3053_v54 = vpack.c.bf16 %v2495_v52, %v2494_v51 }
 0x528   :  { %2836 = vmatprep.subr.mxu1 %v3250_v5 }
 0x529   :  { %3054 = vmatprep.subr.bf16.mxu0 %v3053_v54 }
 0x52a   :  { %3056 = vmatpush3.bf16.msra.mxu0 %v3053_v54 }
 0x52b   :  { %2845 = vmatprep.subr.msk.mxu0 %vm115_vm1, %v2496_v25 }
 0x52e   :  { %2846 = vmatpush3.msk.msra.mxu0 %vm115_vm1, %v2496_v25  ;;  %v2548_v25 = vld [vmem:[%s4017_s5] ss:$0 sm:$0xff] }
 0x5f5   :  { %v1028_v29 = vpop.f32.mrb[14].mxu1 }
 0x5f6   :  { %v1108_v30 = vsel %vm3543_vm6, %v1028_v29, -inf  ;;  %v2825_v31 = vpop.f32.mrb[15].mxu1  ;;  %v3057_v29 = vpack.c.bf16 %v693_v28, %v692_v27 }
 0x5f7   :  { %v1110_v32 = vsel %vm523_vm7, %v1108_v30, -inf }
 0x5f8   :  { %1111 = vmax.xlane.f32.xlu0 %v1110_v32  ;;  %3058 = vmatprep.subr.bf16.mxu0 %v3057_v29 }
 0x5f9   :  { %v1104_v33 = vpop.f32.mrb[16].mxu1 }
 0x5fa   :  { %v1109_v34 = vsel %vm3543_vm6, %v1104_v33, -inf  ;;  %v2830_v35 = vpop.f32.mrb[17].mxu1  ;;  %v694_v33 = vld [vmem:[%s4016_s4 + $0x10] sm:$0xf] }
 0x5fb   :  { %v1113_v36 = vsel %vm523_vm7, %v1109_v34, -inf  ;;  %v2515_v35 = vld [vmem:[%s4014_s2 + $0x88] sm:$0xff] }
 0x5fc   :  { %1114 = vmax.xlane.f32.xlu1 %v1113_v36 }
 0x685   :  { %v1112_v37 = vpop.xlane.xlu0 %1111 }
 0x686   :  { %v1116_v39 = vsub.f32 %v1108_v30, %v1112_v37 }
 0x688   :  { %v1118_v41 = vmul.f32 1.442695, %v1116_v39  ;;  %v2516_v39 = vld [vmem:[%s4014_s2 + $0x90] sm:$0xff] }
 0x689   :  { %v1115_v43 = vpop.xlane.xlu1 %1114 }
 0x68a   :  { %3205 = vpow2.f32 %v1118_v41  ;;  %v1117_v44 = vsub.f32 %v1109_v34, %v1115_v43  ;;  %v2514_v34 = vld [vmem:[%s4014_s2 + $0x80] sm:$0xff]  ;;  %v2517_v41 = vld [vmem:[%s4014_s2 + $0x98] sm:$0xff] }
 0x68b   :  { %v3079_v37 = vpack.c.bf16 %v2515_v35, %v2514_v34  ;;  %v3083_v43 = vpack.c.bf16 %v2517_v41, %v2516_v39 }
 0x68c   :  { %v1120_v45 = vmul.f32 1.442695, %v1117_v44  ;;  %v2518_v44 = vld [vmem:[%s4014_s2 + $0xa0] sm:$0xff] }
 0x68e   :  { %3207 = vpow2.f32 %v1120_v45 }
 0x694   :  { %v3206_v46 = vpop.eup %3205 }
 0x695   :  { %v1122_v48 = vsel %vm523_vm7, %v3206_v46, 0.0 }
 0x696   :  { %1123 = vadd.xlane.f32.xlu0 %v1122_v48  ;;  %v2521_v48 = vld [vmem:[%s4014_s2 + $0xb8] sm:$0xf] }
 0x698   :  { %v3208_v49 = vpop.eup %3207 }
 0x699   :  { %v1125_v50 = vsel %vm523_vm7, %v3208_v49, 0.0 }
 0x69a   :  { %1126 = vadd.xlane.f32.xlu1 %v1125_v50 }
 0x723   :  { %v1124_v55 = vpop.xlane.xlu0 %1123 }
 0x724   :  { %3209 = vrcp.f32 %v1124_v55 }
 0x727   :  { %v1127_v56 = vpop.xlane.xlu1 %1126 }
 0x728   :  { %3211 = vrcp.f32 %v1127_v56 }
 0x72e   :  { %v3210_v59 = vpop.eup %3209 }
 0x72f   :  { %v1130_v60 = vmul.f32 %v3210_v59, %v3206_v46  ;;  %v2520_v46 = vld [vmem:[%s4014_s2 + $0xb0] sm:$0xff] }
 0x731   :  { %2834 = vmatmul.mubr.msk.f32.vlgmr.msra.gmra.mrb[18].mxu1 %vm523_vm7, %v1130_v60 }
 0x732   :  { %v3212_v2 = vpop.eup %3211  ;;  %2837 = vmatpush3.msra.mxu1 %v3555_v53  ;;  %2838 = vmatprep.mubr.msk.f32.mxu1 %vm3251_vm4, %v3250_v5  ;;  %v3069_v53 = vpack.c.bf16 %v2508_v7, %v2507_v6 }
 0x733   :  { %v1131_v3 = vmul.f32 %v3212_v2, %v3208_v49  ;;  %3062 = vmatprep.subr.bf16.mxu1 %v3061_v61  ;;  %v3091_v49 = vpack.c.bf16 %v2521_v48, %v2520_v46  ;;  %v2181_v46 = vld [vmem:[%s4018_s6 + $0x18] sm:$0xff] }
 0x735   :  { %2839 = vmatmul.mubr.msk.f32.vlgmr.msra.gmra.mrb[20].mxu1 %vm523_vm7, %v1131_v3 }
 0x736   :  { %3064 = vmatpush3.bf16.msra.mxu1 %v3061_v61  ;;  %2875 = vmatprep.mubr.msk.f32.mxu1 %vm52_vm0, %v3394_v42 }
 0x737   :  { %3066 = vmatprep.subr.bf16.mxu1 %v3065_v4 }
 0x73a   :  { %3068 = vmatpush3.bf16.msra.mxu1 %v3065_v4 }
 0x73b   :  { %3070 = vmatprep.subr.bf16.mxu1 %v3069_v53 }
 0x73e   :  { %3072 = vmatpush3.bf16.msra.mxu1 %v3069_v53 }
 0x73f   :  { %3075 = vmatprep.subr.msk.bf16.mxu1 %vm3374_vm3, %v3073_v10 }
 0x742   :  { %3078 = vmatpush3.bf16.msk.msra.mxu1 %vm3374_vm3, %v3073_v10  ;;  %v2543_v10 = vld [vmem:[%s4016_s4 + $0x38] sm:$0xff] }
 0x743   :  { %3098 = vmatprep.subr.bf16.mxu1 %v3097_v13  ;;  %v3115_v11 = vpack.c.bf16 %v2543_v10, %v2542_v9 }
 0x745   :  { %2876 = vmatmul.mubr.msk.f32.vlgmr.msra.gmra.mrb[22].mxu1 %vm52_vm0, %v3404_v47 }
 0x746   :  { %3100 = vmatpush3.bf16.msra.mxu1 %v3097_v13  ;;  %2913 = vmatprep.mubr.msk.f32.mxu1 %vm52_vm0, %v3394_v42 }
 0x747   :  { %3102 = vmatprep.subr.bf16.mxu1 %v3101_v16 }
 0x74a   :  { %3104 = vmatpush3.bf16.msra.mxu1 %v3101_v16 }
 0x74b   :  { %3106 = vmatprep.subr.bf16.mxu1 %v3105_v19 }
 0x74e   :  { %3108 = vmatpush3.bf16.msra.mxu1 %v3105_v19 }
 0x74f   :  { %3111 = vmatprep.subr.msk.bf16.mxu1 %vm3374_vm3, %v3109_v23 }
 0x752   :  { %3114 = vmatpush3.bf16.msk.msra.mxu1 %vm3374_vm3, %v3109_v23 }
 0x753   :  { %2926 = vmatprep.subr.mxu1 %v3250_v5 }
 0x755   :  { %2914 = vmatmul.mubr.msk.f32.vlgmr.msra.gmra.mrb[24].mxu1 %vm52_vm0, %v3404_v47 }
 0x756   :  { %2928 = vmatprep.mubr.msk.f32.mxu1 %vm3251_vm4, %v3250_v5 }
 0x804   :  { %v1201_v30 = vpop.f32.mrb[18].mxu1 }
 0x805   :  { %v2835_v31 = vpop.f32.mrb[19].mxu1  ;;  %2847 = vmatprep.mubr.msk.f32.mxu0 %vm366_vm5, %v1201_v30 }
 0x808   :  { %v1274_v32 = vpop.f32.mrb[20].mxu1 }
 0x809   :  { %v2840_v36 = vpop.f32.mrb[21].mxu1  ;;  %2848 = vmatmul.mubr.msk.f32.vlgmr.msra.gmra.mrb[6].mxu0 %vm366_vm5, %v1274_v32 }
 0x80a   :  { %3060 = vmatpush3.bf16.msra.mxu0 %v3057_v29  ;;  %2856 = vmatprep.mubr.msk.f32.mxu0 %vm366_vm5, %v3601_v22  ;;  %v2519_v22 = vld [vmem:[%s4014_s2 + $0xa8] sm:$0xff] }
 0x80b   :  { %2854 = vmatprep.subr.msk.mxu0 %vm115_vm1, %v694_v33  ;;  %v3087_v45 = vpack.c.bf16 %v2519_v22, %v2518_v44 }
 0x80e   :  { %2855 = vmatpush3.msk.msra.mxu0 %vm115_vm1, %v694_v33 }
 0x80f   :  { %3080 = vmatprep.subr.bf16.mxu0 %v3079_v37 }
 0x811   :  { %2857 = vmatmul.mubr.msk.f32.vlgmr.msra.gmra.mrb[6].mxu0 %vm366_vm5, %v3603_v24 }
 0x812   :  { %3082 = vmatpush3.bf16.msra.mxu0 %v3079_v37  ;;  %2894 = vmatprep.mubr.msk.f32.mxu0 %vm52_vm0, %v3394_v42 }
 0x813   :  { %3084 = vmatprep.subr.bf16.mxu0 %v3083_v43 }
 0x816   :  { %3086 = vmatpush3.bf16.msra.mxu0 %v3083_v43 }
 0x817   :  { %3088 = vmatprep.subr.bf16.mxu0 %v3087_v45 }
 0x818   :  { %v2877_v50 = vpop.f32.mrb[22].mxu1 }
 0x819   :  { %v1528_v51 = vpop.f32.mrb[23].mxu1 }
 0x81a   :  { %3090 = vmatpush3.bf16.msra.mxu0 %v3087_v45  ;;  %v2179_v45 = vld [vmem:[%s4018_s6 + $0x8] sm:$0xff] }
 0x81b   :  { %3093 = vmatprep.subr.msk.bf16.mxu0 %vm3374_vm3, %v3091_v49  ;;  %v3119_v48 = vpack.c.bf16 %v2181_v46, %v2179_v45  ;;  %v2321_v45 = vld [vmem:[%s4020_s8 + $0xb0] sm:$0xff]  ;;  %v2322_v46 = vld [vmem:[%s4020_s8 + $0xb8] sm:$0xff] }
 0x81e   :  { %3096 = vmatpush3.bf16.msk.msra.mxu0 %vm3374_vm3, %v3091_v49  ;;  %v2178_v49 = vld [vmem:[%s4018_s6] sm:$0xff] }
 0x81f   :  { %2916 = vmatprep.subr.mxu0 %v3250_v5 }
 0x821   :  { %2895 = vmatmul.mubr.msk.f32.vlgmr.msra.gmra.mrb[8].mxu0 %vm52_vm0, %v3404_v47 }
 0x822   :  { %2918 = vmatprep.mubr.msk.f32.mxu0 %vm3251_vm4, %v3250_v5 }
 0x828   :  { %v2915_v42 = vpop.f32.mrb[24].mxu1 }
 0x829   :  { %v1702_v24 = vpop.f32.mrb[25].mxu1 }
 0x82a   :  { %2927 = vmatpush3.msra.mxu1 %v1702_v24  ;;  %v2185_v24 = vld [vmem:[%s4018_s6 + $0x38] sm:$0xff] }
 0x82b   :  { %3120 = vmatprep.subr.bf16.mxu1 %v3119_v48  ;;  %v3171_v48 = vpack.c.bf16 %v2322_v46, %v2321_v45 }
 0x8f4   :  { %v2896_v52 = vpop.f32.mrb[8].mxu0 }
 0x8f5   :  { %v1615_v54 = vpop.f32.mrb[9].mxu0 }
 0x8f6   :  { %2917 = vmatpush3.xpose.msk.msra.mxu0 %vm366_vm5, %v1615_v54  ;;  %v2182_v54 = vld [vmem:[%s4018_s6 + $0x20] sm:$0xff] }
 0x8f7   :  { %2921 = vmatprep.subr.mxu0 %v3250_v5 }
 0x8f9   :  { %2919 = vmatmul.mubr.msk.f32.vlgmr.msra.gmra.mrb[10].mxu0 %vm366_vm5, %v1528_v51 }
 0x8fa   :  { %2922 = vmatpush3.xpose.msk.msra.mxu0 %vm366_vm5, %v2896_v52  ;;  %2923 = vmatprep.mubr.msk.f32.mxu0 %vm3251_vm4, %v3250_v5 }
 0x8fb   :  { %2931 = vmatprep.subr.mxu0 %v3250_v5 }
 0x8fd   :  { %2924 = vmatmul.mubr.msk.f32.vlgmr.msra.gmra.mrb[12].mxu0 %vm366_vm5, %v2877_v50  ;;  %v2180_v50 = vld [vmem:[%s4018_s6 + $0x10] sm:$0xff] }
 0x8fe   :  { %2932 = vmatpush3.msra.mxu0 %v2915_v42  ;;  %2933 = vmatprep.mubr.msk.f32.mxu0 %vm3251_vm4, %v3250_v5  ;;  %v3121_v51 = vpack.c.bf16 %v2180_v50, %v2178_v49  ;;  %v2183_v42 = vld [vmem:[%s4018_s6 + $0x28] sm:$0xff]  ;;  %v2323_v49 = vld [vmem:[%s4020_s8 + $0xc0] sm:$0xff] }
 0x8ff   :  { %3116 = vmatprep.subr.bf16.mxu0 %v3115_v11  ;;  %v3123_v52 = vpack.c.bf16 %v2185_v24, %v2183_v42  ;;  %v2324_v50 = vld [vmem:[%s4020_s8 + $0xc8] sm:$0xff] }
 0x9cc   :  { %v1783_v47 = vpop.f32.mrb[10].mxu0 }
 0x9cd   :  { %v1863_v55 = vsel %vm3543_vm6, %v1783_v47, -inf  ;;  %v2920_v56 = vpop.f32.mrb[11].mxu0  ;;  %v2184_v47 = vld [vmem:[%s4018_s6 + $0x30] sm:$0xff] }
 0x9ce   :  { %v1865_v57 = vsel %vm523_vm7, %v1863_v55, -inf  ;;  %v2187_v56 = vld [vmem:[%s4018_s6 + $0x48] sm:$0xff] }
 0x9cf   :  { %1866 = vmax.xlane.f32.xlu0 %v1865_v57  ;;  %v2189_v57 = vld [vmem:[%s4018_s6 + $0x58] sm:$0xff] }
 0x9d0   :  { %v1859_v58 = vpop.f32.mrb[12].mxu0 }
 0x9d1   :  { %v1864_v59 = vsel %vm3543_vm6, %v1859_v58, -inf  ;;  %v2925_v60 = vpop.f32.mrb[13].mxu0  ;;  %v3127_v58 = vpack.c.bf16 %v2189_v57, %v2187_v56 }
 0x9d2   :  { %v1868_v61 = vsel %vm523_vm7, %v1864_v59, -inf  ;;  %v2188_v60 = vld [vmem:[%s4018_s6 + $0x50] sm:$0xff] }
 0x9d3   :  { %1869 = vmax.xlane.f32.xlu1 %v1868_v61 }
 0xa5c   :  { %v1867_v62 = vpop.xlane.xlu0 %1866 }
 0xa5d   :  { %v1871_v63 = vsub.f32 %v1863_v55, %v1867_v62  ;;  %v3125_v55 = vpack.c.bf16 %v2184_v47, %v2182_v54  ;;  %v2191_v62 = vld [vmem:[%s4018_s6 + $0x68] sm:$0xff] }
 0xa5f   :  { %v1873_v2 = vmul.f32 1.442695, %v1871_v63  ;;  %v2193_v63 = vld [vmem:[%s4018_s6 + $0x78] sm:$0xf] }
 0xa60   :  { %v1870_v3 = vpop.xlane.xlu1 %1869 }
 0xa61   :  { %3213 = vpow2.f32 %v1873_v2  ;;  %v1872_v4 = vsub.f32 %v1864_v59, %v1870_v3  ;;  %v2186_v59 = vld [vmem:[%s4018_s6 + $0x40] sm:$0xff]  ;;  %v3131_v2 = vpack.c.bf16 %v2193_v63, %v2191_v62 }
 0xa62   :  { %v3129_v61 = vpack.c.bf16 %v2188_v60, %v2186_v59  ;;  %v2190_v3 = vld [vmem:[%s4018_s6 + $0x60] sm:$0xff] }
 0xa63   :  { %v1875_v6 = vmul.f32 1.442695, %v1872_v4  ;;  %v2192_v4 = vld [vmem:[%s4018_s6 + $0x70] sm:$0xf] }
 0xa65   :  { %3215 = vpow2.f32 %v1875_v6  ;;  %v3134_v6 = vpack.c.bf16 %v2192_v4, %v2190_v3 }
 0xa6b   :  { %v3214_v7 = vpop.eup %3213 }
 0xa6c   :  { %v1877_v53 = vsel %vm523_vm7, %v3214_v7, 0.0 }
 0xa6d   :  { %1878 = vadd.xlane.f32.xlu0 %v1877_v53  ;;  %v2300_v53 = vld [vmem:[%s4020_s8 + $0x8] sm:$0xff] }
 0xa6f   :  { %v3216_v8 = vpop.eup %3215 }
 0xa70   :  { %v1880_v40 = vsel %vm523_vm7, %v3216_v8, 0.0 }
 0xa71   :  { %1881 = vadd.xlane.f32.xlu1 %v1880_v40  ;;  %v3252_v40 = vmov 0.0|0.0  }
 0xafa   :  { %v1879_v12 = vpop.xlane.xlu0 %1878 }
 0xafb   :  { %3217 = vrcp.f32 %v1879_v12  ;;  %v2304_v12 = vld [vmem:[%s4020_s8 + $0x28] sm:$0xff] }
 0xafe   :  { %v1882_v13 = vpop.xlane.xlu1 %1881 }
 0xaff   :  { %3219 = vrcp.f32 %v1882_v13 }
 0xb05   :  { %v3218_v14 = vpop.eup %3217 }
 0xb06   :  { %v1885_v15 = vmul.f32 %v3218_v14, %v3214_v7  ;;  %v2299_v7 = vld [vmem:[%s4020_s8] sm:$0xff]  ;;  %v2305_v14 = vld [vmem:[%s4020_s8 + $0x30] sm:$0xff] }
 0xb07   :  { %v3138_v9 = vpack.c.bf16 %v2300_v53, %v2299_v7  ;;  %v2198_v53 = vsub.s32 0, %v3540_v38 }
 0xb08   :  { %2929 = vmatmul.mubr.msk.f32.vlgmr.msra.gmra.mrb[26].mxu1 %vm523_vm7, %v1885_v15  ;;  %v2306_v15 = vld [vmem:[%s4020_s8 + $0x38] sm:$0xff] }
 0xb09   :  { %v3220_v16 = vpop.eup %3219  ;;  %2282 = vmatprep.mubr.f32.mxu1 %v3250_v5  ;;  %3122 = vmatpush1.bf16.msra.mxu1 %v3121_v51  ;;  %v3174_v51 = vpack.c.bf16 %v2324_v50, %v2323_v49 }
 0xb0a   :  { %v1886_v17 = vmul.f32 %v3220_v16, %v3216_v8  ;;  %3124 = vmatprep.subr.bf16.mxu1 %v3123_v52  ;;  %v2301_v8 = vld [vmem:[%s4020_s8 + $0x10] sm:$0xff]  ;;  %v3147_v16 = vpack.c.bf16 %v2306_v15, %v2305_v14 }
 0xb0b   :  { %v3141_v10 = vpack.c.bf16 %v2302_v26, %v2301_v8  ;;  %v2194_v8 = vld [vmem:[%s4019_s7] sm:$0x3] }
 0xb0c   :  { %2934 = vmatmul.mubr.msk.f32.vlgmr.msra.gmra.mrb[14].mxu0 %vm523_vm7, %v1886_v17  ;;  %v2307_v17 = vld [vmem:[%s4020_s8 + $0x40] sm:$0xff]  ;;  %v2199_v26 = vrot.slane %v2194_v8, %v2198_v53 }
 0xb0d   :  { %3118 = vmatpush3.bf16.msra.mxu0 %v3115_v11  ;;  %3126 = vmatpush1.bf16.msra.mxu1 %v3125_v55  ;;  %v2303_v11 = vld [vmem:[%s4020_s8 + $0x20] sm:$0xff] }
 0xb0e   :  { %2940 = vmatprep.subr.msk.mxu0 %vm115_vm1, %v2544_v18  ;;  %3128 = vmatprep.subr.bf16.mxu1 %v3127_v58  ;;  %v3144_v13 = vpack.c.bf16 %v2304_v12, %v2303_v11  ;;  %v2549_v58 = vld [vmem:[%s4024_s12] ss:$0 sm:$0xff] }
 0xb11   :  { %2941 = vmatpush3.msk.msra.mxu0 %vm115_vm1, %v2544_v18  ;;  %3130 = vmatpush1.bf16.msra.mxu1 %v3129_v61  ;;  %v2308_v18 = vld [vmem:[%s4020_s8 + $0x48] sm:$0xff]  ;;  %v2550_v61 = vld [vmem:[%s4025_s13] ss:$0 sm:$0xff] }
 0xb12   :  { %3133 = vmatprep.subr.msk.bf16.mxu1 %vm3374_vm3, %v3131_v2  ;;  %3137 = vmatprep.subr.bf16.mxu0 %v3252_v40 }
 0xb15   :  { %3136 = vmatpush1.bf16.msk.msra.mxu1 %vm3374_vm3, %v3134_v6  ;;  %v2327_v6 = vld [vmem:[%s4020_s8 + $0xe0] sm:$0xff] }
 0xbdb   :  { %v1956_v19 = vpop.f32.mrb[26].mxu1 }
 0xbdc   :  { %v2930_v20 = vpop.f32.mrb[27].mxu1  ;;  %2942 = vmatprep.mubr.msk.f32.mxu0 %vm366_vm5, %v1956_v19  ;;  %v3150_v19 = vpack.c.bf16 %v2308_v18, %v2307_v17 }
 0xbdd   :  { %v2309_v20 = vld [vmem:[%s4020_s8 + $0x50] sm:$0xff] }
 0xbdf   :  { %v2029_v21 = vpop.f32.mrb[14].mxu0 }
 0xbe0   :  { %v2935_v23 = vpop.f32.mrb[15].mxu0  ;;  %2943 = vmatmul.mubr.msk.f32.vlgmr.msra.gmra.mrb[6].mxu0 %vm366_vm5, %v2029_v21  ;;  %v2310_v21 = vld [vmem:[%s4020_s8 + $0x58] sm:$0xff] }
 0xbe1   :  { %3139 = vmatpush1.bf16.msra.mxu0 %v3138_v9  ;;  %v3153_v23 = vpack.c.bf16 %v2310_v21, %v2309_v20  ;;  %v2202_v9 = vsub.s32 1, %v3540_v38  ;;  %v2555_v38 = vld [vmem:[%s4021_s9] ss:$0 sm:$0xff] }
 0xbe2   :  { %3140 = vmatprep.subr.bf16.mxu0 %v3252_v40 }
 0xbe5   :  { %3142 = vmatpush1.bf16.msra.mxu0 %v3141_v10 }
 0xbe6   :  { %3143 = vmatprep.subr.bf16.mxu0 %v3252_v40 }
 0xbe9   :  { %3145 = vmatpush1.bf16.msra.mxu0 %v3144_v13 }
 0xbea   :  { %3146 = vmatprep.subr.bf16.mxu0 %v3252_v40 }
 0xbed   :  { %3148 = vmatpush1.bf16.msra.mxu0 %v3147_v16 }
 0xbee   :  { %3149 = vmatprep.subr.bf16.mxu0 %v3252_v40 }
 0xbf1   :  { %3151 = vmatpush1.bf16.msra.mxu0 %v3150_v19 }
 0xbf2   :  { %3152 = vmatprep.subr.bf16.mxu0 %v3252_v40 }
 0xbf5   :  { %3154 = vmatpush1.bf16.msra.mxu0 %v3153_v23 }
 0xbf6   :  { %3155 = vmatprep.subr.bf16.mxu0 %v3252_v40 }
 0xcb3   :  { %v2944_v27 = vpop.f32.mrb[6].mxu0 }
 0xcb4   :  { %v2131_v28 = vadd.f32 %v2944_v27, %v2548_v25  ;;  %v2112_v29 = vpop.f32.mrb[7].mxu0  ;;  %v2312_v27 = vld [vmem:[%s4020_s8 + $0x68] sm:$0xff] }
 0xcb5   :  { %v2130_v30 = vadd.f32 %v2548_v25, %v2112_v29  ;;  %v2311_v25 = vld [vmem:[%s4020_s8 + $0x60] sm:$0xff]  ;;  %v2313_v29 = vld [vmem:[%s4020_s8 + $0x70] sm:$0xff] }
 0xcb6   :  { %v3799_v31 = vadd.f32 %v2131_v28, %v3339_v1  ;;  %v3156_v28 = vpack.c.bf16 %v2312_v27, %v2311_v25 }
 0xcb7   :  { %v3802_v32 = vadd.f32 %v2130_v30, %v3334_v0  ;;  %v2314_v30 = vld [vmem:[%s4020_s8 + $0x78] sm:$0xff] }
 0xcb8   :  { %v2139_v33 = vsel %vm52_vm0, %v3799_v31, 0.0  ;;  %3157 = vmatpush1.bf16.msra.mxu0 %v3156_v28 }
 0xcb9   :  { %2140 = vadd.xlane.f32.xlu1 %v2139_v33  ;;  %v2136_v34 = vsel %vm52_vm0, %v3802_v32, 0.0  ;;  %v3159_v33 = vpack.c.bf16 %v2314_v30, %v2313_v29  ;;  %3158 = vmatprep.subr.bf16.mxu0 %v3252_v40 }
 0xcba   :  { %2137 = vadd.xlane.f32.xlu0 %v2136_v34  ;;  %v2315_v34 = vld [vmem:[%s4020_s8 + $0x80] sm:$0xff] }
 0xcbc   :  { %3160 = vmatpush1.bf16.msra.mxu0 %v3159_v33 }
 0xcbd   :  { %3161 = vmatprep.subr.bf16.mxu0 %v3252_v40 }
 0xd46   :  { %v2141_v35 = vpop.xlane.xlu1 %2140 }
 0xd47   :  { %v2143_v36 = vmul.f32 0.016666668, %v2141_v35  ;;  %v2138_v37 = vpop.xlane.xlu0 %2137  ;;  %v2316_v35 = vld [vmem:[%s4020_s8 + $0x88] sm:$0xff] }
 0xd48   :  { %v2142_v39 = vmul.f32 0.016666668, %v2138_v37  ;;  %v2317_v37 = vld [vmem:[%s4020_s8 + $0x90] sm:$0xff] }
 0xd49   :  { %v3809_v41 = vsub.f32 %v3799_v31, %v2143_v36  ;;  %v3162_v36 = vpack.c.bf16 %v2316_v35, %v2315_v34 }
 0xd4a   :  { %v3812_v1 = vsub.f32 %v3802_v32, %v2142_v39  ;;  %v2318_v39 = vld [vmem:[%s4020_s8 + $0x98] sm:$0xff] }
 0xd4b   :  { %v2147_v0 = vmul.f32 %v3809_v41, %v3809_v41  ;;  %3163 = vmatpush1.bf16.msra.mxu0 %v3162_v36 }
 0xd4c   :  { %v2146_v43 = vmul.f32 %v3812_v1, %v3812_v1  ;;  %3164 = vmatprep.subr.bf16.mxu0 %v3252_v40 }
 0xd4d   :  { %v2151_v44 = vsel %vm52_vm0, %v2147_v0, 0.0  ;;  %v3165_v0 = vpack.c.bf16 %v2318_v39, %v2317_v37 }
 0xd4e   :  { %2152 = vadd.xlane.f32.xlu1 %v2151_v44  ;;  %v2148_v22 = vsel %vm52_vm0, %v2146_v43, 0.0  ;;  %v2319_v43 = vld [vmem:[%s4020_s8 + $0xa0] sm:$0xff]  ;;  %v2320_v44 = vld [vmem:[%s4020_s8 + $0xa8] sm:$0xff] }
 0xd4f   :  { %2149 = vadd.xlane.f32.xlu0 %v2148_v22  ;;  %3166 = vmatpush1.bf16.msra.mxu0 %v3165_v0  ;;  %v3168_v22 = vpack.c.bf16 %v2320_v44, %v2319_v43 }
 0xd50   :  { %3167 = vmatprep.subr.bf16.mxu0 %v3252_v40 }
 0xd53   :  { %3169 = vmatpush1.bf16.msra.mxu0 %v3168_v22 }
 0xd54   :  { %3170 = vmatprep.subr.bf16.mxu0 %v3252_v40 }
 0xd57   :  { %3172 = vmatpush1.bf16.msra.mxu0 %v3171_v48 }
 0xd58   :  { %3173 = vmatprep.subr.bf16.mxu0 %v3252_v40 }
 0xd5b   :  { %3175 = vmatpush1.bf16.msra.mxu0 %v3174_v51 }
 0xd5c   :  { %3176 = vmatprep.subr.bf16.mxu0 %v3252_v40 }
 0xddb   :  { %v2153_v42 = vpop.xlane.xlu1 %2152 }
 0xddc   :  { %v2155_v24 = vmul.f32 0.016666668, %v2153_v42  ;;  %v2150_v52 = vpop.xlane.xlu0 %2149 }
 0xddd   :  { %v2154_v54 = vmul.f32 0.016666668, %v2150_v52 }
 0xdde   :  { %v2157_v47 = vadd.f32 1e-05, %v2155_v24 }
 0xddf   :  { %v2156_v55 = vadd.f32 1e-05, %v2154_v54 }
 0xde0   :  { %3221 = vrsqrt.f32 %v2157_v47 }
 0xde1   :  { %3223 = vrsqrt.f32 %v2156_v55 }
 0xdea   :  { %v3222_v56 = vpop.eup %3221 }
 0xdeb   :  { %v3224_v57 = vpop.eup %3223  ;;  %v2161_v60 = vmul.f32 %v3222_v56, %v3809_v41  ;;  %v2326_v41 = vld [vmem:[%s4020_s8 + $0xd8] sm:$0xff] }
 0xdec   :  { %v2160_v59 = vmul.f32 %v3224_v57, %v3812_v1  ;;  %v2325_v1 = vld [vmem:[%s4020_s8 + $0xd0] sm:$0xff] }
 0xded   :  { %v2169_v2 = vmul.f32 %v2549_v58, %v2161_v60  ;;  %v3177_v4 = vpack.c.bf16 %v2326_v41, %v2325_v1 }
 0xdee   :  { %v2168_v62 = vmul.f32 %v2549_v58, %v2160_v59 }
 0xdef   :  { %v2177_v3 = vadd.f32 %v2550_v61, %v2169_v2  ;;  %3178 = vmatpush1.bf16.msra.mxu0 %v3177_v4 }
 0xdf0   :  { %v2176_v63 = vadd.f32 %v2550_v61, %v2168_v62  ;;  %3179 = vmatprep.subr.bf16.mxu0 %v3252_v40  ;;  %v2203_v40 = vrot.slane %v2194_v8, %v2202_v9 }
 0xdf2   :  { %2553 = vmatmul.mubr.msk.f32.vlgmr.msra.gmra.mrb[28].mxu1 %vm52_vm0, %v2176_v63 }
 0xdf3   :  { %2288 = vmatprep.mubr.f32.mxu1 %v3250_v5  ;;  %v2328_v5 = vld [vmem:[%s4020_s8 + $0xe8] sm:$0xff] }
 0xdf4   :  { %v3180_v7 = vpack.c.bf16 %v2328_v5, %v2327_v6 }
 0xdf6   :  { %2554 = vmatmul.mubr.msk.f32.gmra.mrb[30].mxu1 %vm52_vm0, %v2177_v3  ;;  %3181 = vmatpush1.bf16.msra.mxu0 %v3180_v7 }
 0xec5   :  { %v2284_v10 = vpop.f32.mrb[28].mxu1 }
 0xec6   :  { %v2285_v11 = vadd.f32 %v2284_v10, %v2199_v26  ;;  %v2286_v12 = vpop.f32.mrb[29].mxu1 }
 0xec7   :  { %v2287_v13 = vadd.f32 %v2286_v12, %v2203_v40 }
 0xec8   :  { %v2295_v16 = vmax.f32 %v2285_v11, 0.0 }
 0xec9   :  { %v2296_v14 = vmax.f32 %v2287_v13, 0.0  ;;  %v2290_v15 = vpop.f32.mrb[30].mxu1 }
 0xeca   :  { %v2291_v17 = vadd.f32 %v2290_v15, %v2199_v26  ;;  %v2292_v18 = vpop.f32.mrb[31].mxu1 }
 0xecb   :  { %v2293_v19 = vadd.f32 %v2292_v18, %v2203_v40  ;;  %2556 = vmatprep.mubr.msk.f32.mxu0 %vm2336_vm8, %v2296_v14 }
 0xecc   :  { %2408 = vmatmul.mubr.f32.vlgmr.msra.gmra.mrb[16].mxu0 %v2295_v16  ;;  %v2297_v21 = vmax.f32 %v2291_v17, 0.0 }
 0xecd   :  { %v2298_v20 = vmax.f32 %v2293_v19, 0.0 }
 0xecf   :  { %2557 = vmatprep.mubr.msk.f32.mxu0 %vm2336_vm8, %v2298_v20 }
 0xed0   :  { %2413 = vmatmul.mubr.f32.gmra.mrb[18].mxu0 %v2297_v21 }
 0xf9f   :  { %v2409_v23 = vpop.f32.mrb[16].mxu0 }
 0xfa0   :  { %v2410_v25 = vadd.f32 %v2555_v38, %v2409_v23  ;;  %v2411_v27 = vpop.f32.mrb[17].mxu0 }
 0xfa2   :  { %v2418_v28 = vadd.f32 %v2410_v25, %v3802_v32 }
 0xfa3   :  { %v2414_v29 = vpop.f32.mrb[18].mxu0 }
 0xfa4   :  { %2420 = vst.msk [vmem:[#allocation2] sm:$0xff] %vm52_vm0, %v2418_v28  ;;  %v2415_v30 = vadd.f32 %v2555_v38, %v2414_v29  ;;  %v2416_v33 = vpop.f32.mrb[19].mxu0 }
 0xfa6   :  { %v2419_v34 = vadd.f32 %v2415_v30, %v3799_v31 }
 0xfa8   :  { %2421 = vst.msk [vmem:[#allocation2 + $0x8] sm:$0xff] %vm52_vm0, %v2419_v34 }
 0xfa9   :  { %3236 = shalt.err (!%p3233_p4)
}
 0xfaa   :  { %s3237_s5 = scalar_lea.hbm %s4026_s14, 256 }
 0xfab   :  { %p3238_p5 = scmp.ne.s32.totalorder %s4026_s14, %s3237_s5  ;;  %p3241_p6 = scmp.lt.u32.totalorder %s3237_s5, %s4026_s14 }
 0xfad   :  { %p3243_p7 = pnand %p3241_p6, %p3238_p5 }
 0xfaf   :  { %3246 = shalt.err (!%p3243_p7)
}
 0xfb0   :  { %s3254_s30 = smov 128   ;;  %s3255_s15 = smov 8  }
 0xfb1   :  { %2433 = dma.vmem_to_hbm [thread:$0]  %s2428_s10, 256, %s4026_s14, [#allocation3], %s3254_s30, %s3254_s30, %s3255_s15  }
 0xfb2   :  { %3247 = dma.done.wait [#allocation3], 256  }
 0xfb3   :  { %3248 = vsyncadd [#allocation3], 4294967040 }
 0xfb4   :  { %2437 = vsyncpa [#allocation3], 1 }

</bundles_post_ra>
